<compile_context>
chip_gen: v6e
topology: v6e:2x2x1
jax: 0.10.0
libtpu: 0.0.40
codegen_flags: <defaults>
</compile_context>

<pallas_src>
import functools

import jax
import jax.numpy as jnp
from jax.experimental import pallas as pl
from jax.experimental.pallas import tpu as pltpu

FILTER_SIZES = (1, 2, 3)
N_BRANCH = len(FILTER_SIZES)
OUT_CHANNEL = 100                   # logical channels (PyTorch)
C_PAD = 128                         # channels padded to full lane width
NC_PAD = 128                        # classes padded for a lane-dense store
BN_EPS = 1e-5
NEG_BIG = -1e30                     # bias for padded class columns


# --------------------------------------------------------------------------
# Kernel
# --------------------------------------------------------------------------
def _textcnn_kernel(x_ref, wcat_ref, fcw_ref, slab_ref, out_ref, *, seq_len):
    """One grid step == TB batch rows; x_ref is the flattened (TB*L, D) tile."""
    total = x_ref.shape[0]                       # TB * L
    tb = total // seq_len

    # Build the shifted copies on the narrow (D-lane) f32 tile with two XLU
    # rolls, then lane-concat -> (TB*L, 3*D) bf16 LHS.  Row r of roll(x, T-k)
    # holds x[r+k]; rows whose shifted read crosses a batch-row (or tile)
    # boundary are exactly the invalid conv positions masked below.
    x32 = x_ref[...]                                          # (TB*L, D) f32
    x1 = pltpu.roll(x32, shift=total - 1, axis=0)
    x2 = pltpu.roll(x32, shift=total - 2, axis=0)
    lhs = jnp.concatenate([x32, x1, x2], axis=-1).astype(jnp.bfloat16)

    # Single MXU matmul covering all 3 conv branches (taps folded into K=3*D).
    y = jnp.dot(lhs, wcat_ref[...],
                preferred_element_type=jnp.float32)           # (TB*L, 3*C_PAD)

    slab = slab_ref[...]                                      # (8, C_PAD) f32
    l_iota = jax.lax.broadcasted_iota(jnp.int32, (tb, seq_len, C_PAD), 1)

    pooled = []
    for i, fs in enumerate(FILTER_SIZES):
        # Folded conv-bias + eval-mode BatchNorm affine, then ReLU.
        z = jnp.maximum(y[:, i * C_PAD:(i + 1) * C_PAD] * slab[i:i + 1, :]
                        + slab[3 + i:4 + i, :], 0.0)
        z = z.reshape(tb, seq_len, C_PAD)
        if fs > 1:
            # Zero out invalid sequence positions (l >= L - fs + 1); valid
            # ReLU outputs are >= 0 so the max-pool result is unchanged.
            z = jnp.where(l_iota < (seq_len - fs + 1), z, 0.0)
        pooled.append(jnp.max(z, axis=1))                     # (TB, C_PAD)

    # Tiny fc matmul in bf16 (f32 accumulation) + f32 bias + softmax.
    merged = jnp.concatenate(pooled, axis=-1).astype(jnp.bfloat16)  # (TB, 3*C_PAD)
    logits = jnp.dot(merged, fcw_ref[...],
                     preferred_element_type=jnp.float32) + slab[6:7, :]
    m = jnp.max(logits, axis=-1, keepdims=True)
    e = jnp.exp(logits - m)
    out_ref[...] = e * pl.reciprocal(jnp.sum(e, axis=-1, keepdims=True),
                                     approx=True)


# --------------------------------------------------------------------------
# Wrapper-side helpers
# --------------------------------------------------------------------------
def _round_up(x, m):
    return (x + m - 1) // m * m


def _pad_lane(v, n):
    return jnp.zeros((n,), jnp.float32).at[:v.shape[0]].set(v.astype(jnp.float32))


def _vmem_capacity_bytes():
    try:
        return int(pltpu.get_tpu_info().vmem_capacity_bytes)
    except Exception:
        return 64 << 20        # conservative fallback = v7x per-TensorCore VMEM


def _pick_batch_tile(B, L, D, budget_bytes):
    """Largest sublane-aligned batch tile whose per-step working set fits."""
    # Conservative per-batch-row VMEM bytes:
    #   2x double-buffered f32 x tile + roll temps + bf16 LHS   -> 22*D
    #   f32 y (3*C_PAD) + ~2 branch temps (affine/mask copies)  -> 20*C_PAD
    per_row = L * (22 * D + 20 * C_PAD)
    cap = max(8, ((budget_bytes // per_row) // 8) * 8)
    b_pad = _round_up(B, 8)
    tb = min(cap, b_pad)
    # Megacore (v7x): give the grid >=4 steps when the batch is big enough
    # that each piece still amortizes the per-step overhead; on single-TC
    # chips small batches keep the single largest tile.
    if tb == b_pad and b_pad >= 256:
        tb = _round_up(b_pad // 4, 8)
    return tb


def prepack_params(params, num_class):
    """One-time packing of weights (hoisted out of the per-call hot path)."""
    C = OUT_CHANNEL
    D = params["conv0_w"].shape[1]
    assert num_class <= NC_PAD

    # Conv weight: (3*D, 3*C_PAD).  Row block t = tap t (x shifted by t),
    # column block i = branch i; taps a branch does not use stay zero.
    wcat = jnp.zeros((3 * D, N_BRANCH * C_PAD), jnp.float32)
    for i, fs in enumerate(FILTER_SIZES):
        w = params[f"conv{i}_w"]                 # (fs, D, C)
        for tap in range(fs):
            wcat = wcat.at[tap * D:(tap + 1) * D,
                           i * C_PAD:i * C_PAD + C].set(w[tap])
    wcat = wcat.astype(jnp.bfloat16)

    # fc weight rearranged to padded-channel rows, classes padded to 128, bf16.
    fcw = jnp.zeros((N_BRANCH * C_PAD, NC_PAD), jnp.float32)
    for i in range(N_BRANCH):
        fcw = fcw.at[i * C_PAD:i * C_PAD + C, :num_class].set(
            params["fc_w"][i * C:(i + 1) * C, :])
    fcw = fcw.astype(jnp.bfloat16)

    # Fold conv bias + eval-mode BN into a per-channel affine (y = acc*a + c)
    # and pack the small vectors into one (8, C_PAD) slab:
    # rows 0-2 = a_i, rows 3-5 = c_i, row 6 = padded fc bias, row 7 = zeros.
    a_rows, c_rows = [], []
    for i in range(N_BRANCH):
        a = params[f"bn{i}_gamma"] / jnp.sqrt(params[f"bn{i}_var"] + BN_EPS)
        c = (params[f"conv{i}_b"] - params[f"bn{i}_mean"]) * a + params[f"bn{i}_beta"]
        a_rows.append(_pad_lane(a, C_PAD))
        c_rows.append(_pad_lane(c, C_PAD))
    fc_b_pad = jnp.full((NC_PAD,), NEG_BIG, jnp.float32).at[:num_class].set(
        params["fc_b"].astype(jnp.float32))
    slab = jnp.stack(a_rows + c_rows
                     + [fc_b_pad, jnp.zeros((C_PAD,), jnp.float32)], axis=0)
    return {"wcat": wcat, "fcw": fcw, "slab": slab}


@functools.partial(jax.jit, static_argnames=("num_class",))
def textcnn_forward(x, packed, num_class):
    B, L, D = x.shape
    assert num_class <= NC_PAD

    vmem_cap = _vmem_capacity_bytes()
    vmem_limit = int(min(vmem_cap * 3 // 4, 96 << 20))
    tb = _pick_batch_tile(B, L, D, vmem_limit // 2)
    b_pad = _round_up(B, tb)

    x_p = x if b_pad == B else jnp.pad(x, ((0, b_pad - B), (0, 0), (0, 0)))
    x_flat = x_p.reshape(b_pad * L, D).astype(jnp.float32)   # cast to bf16 in-kernel

    out = pl.pallas_call(
        functools.partial(_textcnn_kernel, seq_len=L),
        out_shape=jax.ShapeDtypeStruct((b_pad, NC_PAD), jnp.float32),
        grid=(b_pad // tb,),
        in_specs=[
            pl.BlockSpec((tb * L, D), lambda b: (b, 0)),               # x tile
            pl.BlockSpec((3 * D, N_BRANCH * C_PAD), lambda b: (0, 0)),  # conv W
            pl.BlockSpec((N_BRANCH * C_PAD, NC_PAD), lambda b: (0, 0)),  # fc W
            pl.BlockSpec((8, C_PAD), lambda b: (0, 0)),                # affine slab
        ],
        out_specs=pl.BlockSpec((tb, NC_PAD), lambda b: (b, 0)),
        compiler_params=pltpu.CompilerParams(
            dimension_semantics=("parallel",),
            vmem_limit_bytes=vmem_limit),
    )(x_flat, packed["wcat"], packed["fcw"], packed["slab"])
    return out[:B, :num_class]


# --------------------------------------------------------------------------
# Synthetic parameters + pure-JAX reference
# --------------------------------------------------------------------------
def init_params(key, dim, num_class):
    """Deterministic synthetic parameters matching the module's __init__ shapes."""
    C = OUT_CHANNEL
    keys = iter(jax.random.split(key, 20))
    p = {}
    for i, fs in enumerate(FILTER_SIZES):
        # PyTorch Conv2d weight is (C, 1, fs, dim); stored here as (fs, dim, C).
        p[f"conv{i}_w"] = 0.1 * jax.random.normal(next(keys), (fs, dim, C), jnp.float32)
        p[f"conv{i}_b"] = 0.05 * jax.random.normal(next(keys), (C,), jnp.float32)
        p[f"bn{i}_gamma"] = 1.0 + 0.1 * jax.random.normal(next(keys), (C,), jnp.float32)
        p[f"bn{i}_beta"] = 0.1 * jax.random.normal(next(keys), (C,), jnp.float32)
        p[f"bn{i}_mean"] = 0.1 * jax.random.normal(next(keys), (C,), jnp.float32)
        p[f"bn{i}_var"] = 0.5 + jax.random.uniform(next(keys), (C,), jnp.float32)
    # nn.Linear(3C, num_class) -> weight stored transposed as (3C, num_class)
    p["fc_w"] = 0.1 * jax.random.normal(next(keys), (3 * C, num_class), jnp.float32)
    p["fc_b"] = 0.05 * jax.random.normal(next(keys), (num_class,), jnp.float32)
    return p


def reference_forward(x, params):
    """Pure-JAX f32 reference reproducing the PyTorch forward (eval-mode BN)."""
    B, L, D = x.shape
    pooled_all = []
    for i, fs in enumerate(FILTER_SIZES):
        w = params[f"conv{i}_w"]                  # (fs, D, C)
        l_out = L - fs + 1
        conv = jnp.zeros((B, l_out, OUT_CHANNEL), jnp.float32)
        for tap in range(fs):
            conv = conv + jnp.einsum("bld,dc->blc", x[:, tap:tap + l_out, :], w[tap])
        conv = conv + params[f"conv{i}_b"]
        a = params[f"bn{i}_gamma"] / jnp.sqrt(params[f"bn{i}_var"] + BN_EPS)
        y = (conv - params[f"bn{i}_mean"]) * a + params[f"bn{i}_beta"]
        y = jnp.maximum(y, 0.0)
        pooled_all.append(jnp.max(y, axis=1))     # (B, C)
    merged = jnp.concatenate(pooled_all, axis=1)  # (B, 3C)
    logits = merged @ params["fc_w"] + params["fc_b"]
    return jax.nn.softmax(logits, axis=1)


if __name__ == "__main__":
    B, L, D, NUM_CLASS = 16, 16, 32, 4            # batch, max_length, dim, num_class

    key = jax.random.PRNGKey(0)
    kx, kp = jax.random.split(key)
    x = jax.random.normal(kx, (B, L, D), jnp.float32)
    params = init_params(kp, D, NUM_CLASS)

    packed = prepack_params(params, NUM_CLASS)    # one-time weight packing
    out = textcnn_forward(x, packed, NUM_CLASS)
    out = jax.block_until_ready(out)

    ref = reference_forward(x, params)
    assert out.shape == (B, NUM_CLASS)
    # bf16 matmul operands (f32 accumulation) -> slightly loosened tolerance.
    assert jnp.allclose(out, ref, atol=2e-2, rtol=2e-2), (
        float(jnp.max(jnp.abs(out - ref))))
    print("KERNEL_OK")
</pallas_src>

<mosaic_0001>
module attributes {stable_mosaic.version = 11 : i64} {
  func.func @_textcnn_kernel(%arg0: i32, %arg1: memref<256x32xf32, #tpu.memory_space<vmem>>, %arg2: memref<96x384xbf16, #tpu.memory_space<vmem>>, %arg3: memref<384x128xbf16, #tpu.memory_space<vmem>>, %arg4: memref<8x128xf32, #tpu.memory_space<vmem>>, %arg5: memref<16x128xf32, #tpu.memory_space<vmem>>) attributes {dimension_semantics = [#tpu.dimension_semantics<parallel>], iteration_bounds = array<i64: 1>, scalar_prefetch = 0 : i64, scratch_operands = 0 : i64, tpu.core_type = #tpu.core_type<tc>, window_params = [{transform_indices = @transform_0, window_bounds = array<i64: 256, 32>}, {pipeline_mode = #tpu.pipeline_mode<synchronous>, transform_indices = @transform_1, window_bounds = array<i64: 96, 384>}, {pipeline_mode = #tpu.pipeline_mode<synchronous>, transform_indices = @transform_2, window_bounds = array<i64: 384, 128>}, {pipeline_mode = #tpu.pipeline_mode<synchronous>, transform_indices = @transform_3, window_bounds = array<i64: 8, 128>}, {transform_indices = @transform_4, window_bounds = array<i64: 16, 128>}]} {
    %c0 = arith.constant 0 : index
    %c0_0 = arith.constant 0 : index
    %0 = vector.load %arg1[%c0, %c0_0] : memref<256x32xf32, #tpu.memory_space<vmem>>, vector<256x32xf32>
    %c255_i32 = arith.constant 255 : i32
    %1 = tpu.dynamic_rotate %0 by %c255_i32 dim 0 : vector<256x32xf32>, i32 -> vector<256x32xf32>
    %c254_i32 = arith.constant 254 : i32
    %2 = tpu.dynamic_rotate %0 by %c254_i32 dim 0 : vector<256x32xf32>, i32 -> vector<256x32xf32>
    %3 = tpu.concatenate %0, %1, %2 in 1 : vector<256x32xf32>, vector<256x32xf32>, vector<256x32xf32> -> vector<256x96xf32>
    %4 = arith.truncf %3 : vector<256x96xf32> to vector<256x96xbf16>
    %c0_1 = arith.constant 0 : index
    %c0_2 = arith.constant 0 : index
    %5 = vector.load %arg2[%c0_1, %c0_2] : memref<96x384xbf16, #tpu.memory_space<vmem>>, vector<96x384xbf16>
    %cst = arith.constant dense<0.000000e+00> : vector<256x384xf32>
    %6 = tpu.matmul %4, %5, %cst {dimension_numbers = #tpu.dot_dimension_numbers<[1], [0], [0], [1], [0, 0, 1, 1], [], []>} : vector<256x96xbf16>, vector<96x384xbf16>, vector<256x384xf32> -> vector<256x384xf32>
    %c0_3 = arith.constant 0 : index
    %c0_4 = arith.constant 0 : index
    %7 = vector.load %arg4[%c0_3, %c0_4] : memref<8x128xf32, #tpu.memory_space<vmem>>, vector<8x128xf32>
    %8 = tpu.iota {dimensions = array<i32: 1>} : vector<16x16x128xi32>
    %9 = vector.extract_strided_slice %6 {offsets = [0, 0], sizes = [256, 128], strides = [1, 1]} : vector<256x384xf32> to vector<256x128xf32>
    %10 = vector.extract_strided_slice %7 {offsets = [0, 0], sizes = [1, 128], strides = [1, 1]} : vector<8x128xf32> to vector<1x128xf32>
    %11 = vector.broadcast %10 : vector<1x128xf32> to vector<256x128xf32>
    %12 = arith.mulf %9, %11 : vector<256x128xf32>
    %13 = vector.extract_strided_slice %7 {offsets = [3, 0], sizes = [1, 128], strides = [1, 1]} : vector<8x128xf32> to vector<1x128xf32>
    %14 = vector.broadcast %13 : vector<1x128xf32> to vector<256x128xf32>
    %15 = arith.addf %12, %14 : vector<256x128xf32>
    %cst_5 = arith.constant 0.000000e+00 : f32
    %16 = vector.broadcast %cst_5 : f32 to vector<256x128xf32>
    %17 = arith.maximumf %15, %16 : vector<256x128xf32>
    %18 = vector.shape_cast %17 : vector<256x128xf32> to vector<16x16x128xf32>
    %cst_6 = arith.constant dense<0xFF800000> : vector<16x128xf32>
    %19 = vector.multi_reduction <maximumf>, %18, %cst_6 [1] : vector<16x16x128xf32> to vector<16x128xf32>
    %20 = vector.extract_strided_slice %6 {offsets = [0, 128], sizes = [256, 128], strides = [1, 1]} : vector<256x384xf32> to vector<256x128xf32>
    %21 = vector.extract_strided_slice %7 {offsets = [1, 0], sizes = [1, 128], strides = [1, 1]} : vector<8x128xf32> to vector<1x128xf32>
    %22 = vector.broadcast %21 : vector<1x128xf32> to vector<256x128xf32>
    %23 = arith.mulf %20, %22 : vector<256x128xf32>
    %24 = vector.extract_strided_slice %7 {offsets = [4, 0], sizes = [1, 128], strides = [1, 1]} : vector<8x128xf32> to vector<1x128xf32>
    %25 = vector.broadcast %24 : vector<1x128xf32> to vector<256x128xf32>
    %26 = arith.addf %23, %25 : vector<256x128xf32>
    %cst_7 = arith.constant 0.000000e+00 : f32
    %27 = vector.broadcast %cst_7 : f32 to vector<256x128xf32>
    %28 = arith.maximumf %26, %27 : vector<256x128xf32>
    %29 = vector.shape_cast %28 : vector<256x128xf32> to vector<16x16x128xf32>
    %c15_i32 = arith.constant 15 : i32
    %30 = vector.broadcast %c15_i32 : i32 to vector<16x16x128xi32>
    %31 = arith.cmpi slt, %8, %30 : vector<16x16x128xi32>
    %cst_8 = arith.constant 0.000000e+00 : f32
    %32 = vector.broadcast %cst_8 : f32 to vector<16x16x128xf32>
    %33 = arith.select %31, %29, %32 : vector<16x16x128xi1>, vector<16x16x128xf32>
    %cst_9 = arith.constant dense<0xFF800000> : vector<16x128xf32>
    %34 = vector.multi_reduction <maximumf>, %33, %cst_9 [1] : vector<16x16x128xf32> to vector<16x128xf32>
    %35 = vector.extract_strided_slice %6 {offsets = [0, 256], sizes = [256, 128], strides = [1, 1]} : vector<256x384xf32> to vector<256x128xf32>
    %36 = vector.extract_strided_slice %7 {offsets = [2, 0], sizes = [1, 128], strides = [1, 1]} : vector<8x128xf32> to vector<1x128xf32>
    %37 = vector.broadcast %36 : vector<1x128xf32> to vector<256x128xf32>
    %38 = arith.mulf %35, %37 : vector<256x128xf32>
    %39 = vector.extract_strided_slice %7 {offsets = [5, 0], sizes = [1, 128], strides = [1, 1]} : vector<8x128xf32> to vector<1x128xf32>
    %40 = vector.broadcast %39 : vector<1x128xf32> to vector<256x128xf32>
    %41 = arith.addf %38, %40 : vector<256x128xf32>
    %cst_10 = arith.constant 0.000000e+00 : f32
    %42 = vector.broadcast %cst_10 : f32 to vector<256x128xf32>
    %43 = arith.maximumf %41, %42 : vector<256x128xf32>
    %44 = vector.shape_cast %43 : vector<256x128xf32> to vector<16x16x128xf32>
    %c14_i32 = arith.constant 14 : i32
    %45 = vector.broadcast %c14_i32 : i32 to vector<16x16x128xi32>
    %46 = arith.cmpi slt, %8, %45 : vector<16x16x128xi32>
    %cst_11 = arith.constant 0.000000e+00 : f32
    %47 = vector.broadcast %cst_11 : f32 to vector<16x16x128xf32>
    %48 = arith.select %46, %44, %47 : vector<16x16x128xi1>, vector<16x16x128xf32>
    %cst_12 = arith.constant dense<0xFF800000> : vector<16x128xf32>
    %49 = vector.multi_reduction <maximumf>, %48, %cst_12 [1] : vector<16x16x128xf32> to vector<16x128xf32>
    %50 = tpu.concatenate %19, %34, %49 in 1 : vector<16x128xf32>, vector<16x128xf32>, vector<16x128xf32> -> vector<16x384xf32>
    %51 = arith.truncf %50 : vector<16x384xf32> to vector<16x384xbf16>
    %c0_13 = arith.constant 0 : index
    %c0_14 = arith.constant 0 : index
    %52 = vector.load %arg3[%c0_13, %c0_14] : memref<384x128xbf16, #tpu.memory_space<vmem>>, vector<384x128xbf16>
    %cst_15 = arith.constant dense<0.000000e+00> : vector<16x128xf32>
    %53 = tpu.matmul %51, %52, %cst_15 {dimension_numbers = #tpu.dot_dimension_numbers<[1], [0], [0], [1], [0, 0, 1, 1], [], []>} : vector<16x384xbf16>, vector<384x128xbf16>, vector<16x128xf32> -> vector<16x128xf32>
    %54 = vector.extract_strided_slice %7 {offsets = [6, 0], sizes = [1, 128], strides = [1, 1]} : vector<8x128xf32> to vector<1x128xf32>
    %55 = vector.broadcast %54 : vector<1x128xf32> to vector<16x128xf32>
    %56 = arith.addf %53, %55 : vector<16x128xf32>
    %cst_16 = arith.constant dense<0xFF800000> : vector<16xf32>
    %57 = vector.multi_reduction <maximumf>, %56, %cst_16 [1] : vector<16x128xf32> to vector<16xf32>
    %58 = vector.shape_cast %57 : vector<16xf32> to vector<16x1xf32>
    %59 = vector.broadcast %58 : vector<16x1xf32> to vector<16x128xf32>
    %60 = arith.subf %56, %59 : vector<16x128xf32>
    %61 = math.exp %60 : vector<16x128xf32>
    %cst_17 = arith.constant dense<0.000000e+00> : vector<16xf32>
    %62 = vector.multi_reduction <add>, %61, %cst_17 [1] : vector<16x128xf32> to vector<16xf32>
    %63 = vector.shape_cast %62 : vector<16xf32> to vector<16x1xf32>
    %64 = tpu.reciprocal %63 {approx = true} : vector<16x1xf32> -> vector<16x1xf32>
    %65 = vector.broadcast %64 : vector<16x1xf32> to vector<16x128xf32>
    %66 = arith.mulf %61, %65 : vector<16x128xf32>
    %c0_18 = arith.constant 0 : index
    %c0_19 = arith.constant 0 : index
    %67 = vector.load %arg5[%c0_18, %c0_19] : memref<16x128xf32, #tpu.memory_space<vmem>>, vector<16x128xf32>
    tpu.vector_store %arg5[%c0_18, %c0_19], %66 {strides = array<i32>} : memref<16x128xf32, #tpu.memory_space<vmem>>, vector<16x128xf32>,
    return
  }
  func.func @transform_0(%arg0: i32) -> (i32, i32) {
    %c0_i32 = arith.constant 0 : i32
    %c0_i32_0 = arith.constant 0 : i32
    return %arg0, %c0_i32 : i32, i32
  }
  func.func @transform_1(%arg0: i32) -> (i32, i32) {
    %c0_i32 = arith.constant 0 : i32
    %c0_i32_0 = arith.constant 0 : i32
    %c0_i32_1 = arith.constant 0 : i32
    return %c0_i32, %c0_i32_0 : i32, i32
  }
  func.func @transform_2(%arg0: i32) -> (i32, i32) {
    %c0_i32 = arith.constant 0 : i32
    %c0_i32_0 = arith.constant 0 : i32
    %c0_i32_1 = arith.constant 0 : i32
    return %c0_i32, %c0_i32_0 : i32, i32
  }
  func.func @transform_3(%arg0: i32) -> (i32, i32) {
    %c0_i32 = arith.constant 0 : i32
    %c0_i32_0 = arith.constant 0 : i32
    %c0_i32_1 = arith.constant 0 : i32
    return %c0_i32, %c0_i32_0 : i32, i32
  }
  func.func @transform_4(%arg0: i32) -> (i32, i32) {
    %c0_i32 = arith.constant 0 : i32
    %c0_i32_0 = arith.constant 0 : i32
    return %arg0, %c0_i32 : i32, i32
  }
}

</mosaic_0001>

<bundles_post_ra>
// kernel: textcnn_forward.1
= control target key start
LH: loop header
LB: loop body
LE: loop exit
PB: predicated region body
PF: predicated region fallthrough
CT: control target
= control target key end

     0   :  { %9 = vsyncpa [#allocation3], 0  ;;  %s4006_s0 = inlined_call_operand.hbm [shape: f32[256,32], index: 0, kind: input, shape index: {}]   ;;  %s4007_s1 = inlined_call_operand.hbm [shape: bf16[96,384], index: 1, kind: input, shape index: {}]   ;;  %s4008_s2 = inlined_call_operand.hbm [shape: bf16[384,128], index: 2, kind: input, shape index: {}]   ;;  %s4009_s3 = inlined_call_operand.hbm [shape: f32[8,128], index: 3, kind: input, shape index: {}]   ;;  %s4010_s4 = inlined_call_operand.vmem [shape: f32[16,128], index: 4, kind: output, shape index: {}]  }
   0x1   :  { %10 = vsyncpa [#allocation5], 0 }
   0x2   :  { %11 = vsyncpa [#allocation8], 0  ;;  %s2733_s15 = smov [#allocation4]  }
   0x3   :  { %s29_s16 = sshll.u32 %s2733_s15, 4  ;;  %s30_s16 = int_to_ptr.vmem [resolvable:$true] %s29_s16 }
   0x4   :  { %s2655_s17 = scalar_lea.vmem %s30_s16, 2304  ;;  %p2660_p1 = scmp.lt.s32.totalorder %s30_s16, %s30_s16 }
   0x5   :  { %p2656_p0 = scmp.ne.s32.totalorder %s30_s16, %s2655_s17  ;;  %p2661_p2 = scmp.lt.s32.totalorder %s2655_s17, %s2655_s17 }
   0x7   :  { %p2662_p3 = por %p2661_p2, %p2660_p1 }
   0x9   :  { %p2663_p4 = pnand %p2662_p3, %p2656_p0 }
   0xb   :  { %2666 = shalt.err (!%p2663_p4)
}
   0xc   :  { %s2734_s18 = smov 192   ;;  %s2735_s19 = smov 12  }
   0xd   :  { %35 = dma.hbm_to_vmem [thread:$0]  %s4007_s1, 2304, %s30_s16, [#allocation5], %s2734_s18, %s2734_s18, %s2735_s19  }
   0xe   :  { %s2736_s22 = smov [#allocation2]  }
   0xf   :  { %s17_s23 = sshll.u32 %s2736_s22, 4  ;;  %s18_s23 = int_to_ptr.vmem [resolvable:$true] %s17_s23 }
  0x10   :  { %s2675_s24 = scalar_lea.vmem %s18_s23, 4096  ;;  %p2680_p6 = scmp.lt.s32.totalorder %s18_s23, %s18_s23 }
  0x11   :  { %p2676_p5 = scmp.ne.s32.totalorder %s18_s23, %s2675_s24  ;;  %p2681_p7 = scmp.lt.s32.totalorder %s2675_s24, %s2675_s24 }
  0x13   :  { %p2682_p8 = por %p2681_p7, %p2680_p6 }
  0x15   :  { %p2683_p9 = pnand %p2682_p8, %p2676_p5 }
  0x17   :  { %2686 = shalt.err (!%p2683_p9)
}
  0x18   :  { %s2737_s25 = smov 128   ;;  %s2738_s26 = smov 8  }
  0x19   :  { %23 = dma.hbm_to_vmem [thread:$0]  %s4006_s0, 4096, %s18_s23, [#allocation3], %s2737_s25, %s2737_s25, %s2738_s26  }
  0x1a   :  { %s2739_s29 = smov [#allocation6]  }
  0x1b   :  { %s41_s30 = sshll.u32 %s2739_s29, 4  ;;  %s42_s30 = int_to_ptr.vmem [resolvable:$true] %s41_s30 }
  0x1c   :  { %s2695_s1 = scalar_lea.vmem %s42_s30, 3072  ;;  %p2700_p11 = scmp.lt.s32.totalorder %s42_s30, %s42_s30 }
  0x1d   :  { %p2696_p10 = scmp.ne.s32.totalorder %s42_s30, %s2695_s1  ;;  %p2701_p12 = scmp.lt.s32.totalorder %s2695_s1, %s2695_s1 }
  0x1f   :  { %p2702_p13 = por %p2701_p12, %p2700_p11 }
  0x21   :  { %p2703_p0 = pnand %p2702_p13, %p2696_p10 }
  0x23   :  { %2706 = shalt.err (!%p2703_p0)
}
  0x24   :  { %s2740_s5 = smov 64   ;;  %s2741_s6 = smov 4  }
  0x25   :  { %47 = dma.hbm_to_vmem [thread:$0]  %s4008_s2, 3072, %s42_s30, [#allocation5], %s2740_s5, %s2740_s5, %s2741_s6  }
  0x26   :  { %s2742_s9 = smov [#allocation7]  }
  0x27   :  { %s54_s0 = sshll.u32 %s2742_s9, 4  ;;  %s55_s0 = int_to_ptr.vmem [resolvable:$true] %s54_s0 }
  0x28   :  { %s2715_s10 = scalar_lea.vmem %s55_s0, 128  ;;  %p2720_p2 = scmp.lt.s32.totalorder %s55_s0, %s55_s0 }
  0x29   :  { %p2716_p1 = scmp.ne.s32.totalorder %s55_s0, %s2715_s10  ;;  %p2721_p3 = scmp.lt.s32.totalorder %s2715_s10, %s2715_s10 }
  0x2b   :  { %p2722_p4 = por %p2721_p3, %p2720_p2 }
  0x2d   :  { %p2723_p5 = pnand %p2722_p4, %p2716_p1 }
  0x2f   :  { %2726 = shalt.err (!%p2723_p5)
}
  0x30   :  { %57 = dma.hbm_to_vmem [thread:$0]  %s4009_s3, 128, %s55_s0, [#allocation8]  }
  0x31   :  { %2727 = dma.done.wait [#allocation3], 4096  }
  0x32   :  { %2728 = vsyncadd [#allocation3], 4294963200 }
  0x33   :  { %2729 = dma.done.wait [#allocation5], 5376  }
  0x34   :  { %2730 = vsyncadd [#allocation5], 4294961920 }
  0x35   :  { %2731 = dma.done.wait [#allocation8], 128  }
  0x36   :  { %2732 = vsyncadd [#allocation8], 4294967168  ;;  %v135_v0 = vlaneseq  ;;  %v2788_v2 = vld [vmem:[#allocation2] sm:$0xff]  ;;  %v2790_v3 = vld [vmem:[#allocation2 + $0x8] sm:$0xff]  ;;  %s2743_s2 = smov 32   ;;  %vm491_vm2 = vcmask 261120  }
  0x37   :  { %v2792_v4 = vld [vmem:[#allocation2 + $0x10] sm:$0xff]  ;;  %v103_v5 = vrot.slane %v2788_v2, 1  ;;  %v104_v6 = vrot.slane %v2790_v3, 1  ;;  %v2798_v8 = vld [vmem:[#allocation2 + $0x18] sm:$0xff]  ;;  %v2800_v9 = vld [vmem:[#allocation2 + $0x20] sm:$0xff]  ;;  %v170_v17 = vrot.slane %v2788_v2, 2 }
  0x38   :  { %v2786_v1 = vshrl.u32 %v135_v0, 7  ;;  %v105_v7 = vrot.slane %v2792_v4, 1  ;;  %v2809_v12 = vld [vmem:[#allocation2 + $0x28] sm:$0xff]  ;;  %v2811_v13 = vld [vmem:[#allocation2 + $0x30] sm:$0xff]  ;;  %v106_v15 = vrot.slane %v2798_v8, 1  ;;  %v107_v16 = vrot.slane %v2800_v9, 1 }
  0x39   :  { %v171_v18 = vrot.slane %v2790_v3, 2  ;;  %v172_v19 = vrot.slane %v2792_v4, 2  ;;  %v173_v20 = vrot.slane %v2798_v8, 2  ;;  %v174_v21 = vrot.slane %v2800_v9, 2  ;;  %v2835_v30 = vld [vmem:[#allocation2 + $0x38] sm:$0xff]  ;;  %v2837_v31 = vld [vmem:[#allocation2 + $0x40] sm:$0xff] }
  0x3a   :  { %4026 = vst [vmem:[#allocation12_spill] sm:$0xff] %v2786_v1  ;;  %vm137_vm0 = vcmp.lt.s32.totalorder %v2786_v1, 7  ;;  %vm202_vm1 = vcmp.lt.s32.totalorder %v2786_v1, 6  ;;  %v108_v24 = vrot.slane %v2809_v12, 1  ;;  %v109_v25 = vrot.slane %v2811_v13, 1  ;;  %v2845_v36 = vld [vmem:[#allocation2 + $0x48] sm:$0xff] }
  0x3b   :  { %v167_v10 = vsel %vm137_vm0, %v104_v6, %v105_v7  ;;  %v168_v11 = vsel %vm137_vm0, %v103_v5, %v104_v6  ;;  %v165_v22 = vsel %vm137_vm0, %v106_v15, %v107_v16  ;;  %v166_v23 = vsel %vm137_vm0, %v105_v7, %v106_v15  ;;  %v2847_v37 = vld [vmem:[#allocation2 + $0x50] sm:$0xff]  ;;  %v2857_v46 = vld [vmem:[#allocation2 + $0x58] sm:$0xff]  ;;  %v2859_v47 = vld [vmem:[#allocation2 + $0x60] sm:$0xff] }
  0x3c   :  { %v2430_v14 = vpack.i.bf16 %v167_v10, %v168_v11  ;;  %v2440_v26 = vpack.i.bf16 %v165_v22, %v166_v23  ;;  %v232_v27 = vsel %vm202_vm1, %v171_v18, %v172_v19  ;;  %v233_v28 = vsel %vm202_vm1, %v170_v17, %v171_v18  ;;  %v2867_v52 = vld [vmem:[#allocation2 + $0x68] sm:$0xff]  ;;  %v2869_v53 = vld [vmem:[#allocation2 + $0x70] sm:$0xff]  ;;  %v2592_v57 = vld [vmem:[#allocation4 + $0x78] ss:$12 sps:$4 sm:$0xff]  }
  0x3d   :  { %v230_v29 = vsel %vm202_vm1, %v173_v20, %v174_v21  ;;  %v2435_v32 = vpack.i.bf16 %v232_v27, %v233_v28  ;;  %v231_v33 = vsel %vm202_vm1, %v172_v19, %v173_v20  ;;  %v163_v34 = vsel %vm137_vm0, %v108_v24, %v109_v25  ;;  %v2590_v56 = vld [vmem:[#allocation4 + $0x7c] ss:$12 sps:$4 sm:$0xff]   ;;  %v2593_v62 = vld [vmem:[#allocation4 + $0x80] ss:$12 sps:$4 sm:$0xff]   ;;  %v2594_v10 = vld [vmem:[#allocation4 + $0x64] ss:$12 sps:$4 sm:$0xff]  }
  0x3e   :  { %2431 = vrot.lane.b32.xlu0 %v2430_v14, %s2743_s2  ;;  %v164_v35 = vsel %vm137_vm0, %v107_v16, %v108_v24  ;;  %2441 = vrot.lane.b32.xlu1 %v2440_v26, %s2743_s2  ;;  %v2445_v38 = vpack.i.bf16 %v230_v29, %v231_v33  ;;  %v175_v40 = vrot.slane %v2809_v12, 2  ;;  %v176_v41 = vrot.slane %v2811_v13, 2  ;;  %v2596_v18 = vld [vmem:[#allocation4 + $0x60] ss:$12 sps:$4 sm:$0xff]   ;;  %v2897_v23 = vld [vmem:[#allocation2 + $0x78] sm:$0xff] }
  0x3f   :  { %v2450_v39 = vpack.i.bf16 %v163_v34, %v164_v35  ;;  %v110_v42 = vrot.slane %v2835_v30, 1  ;;  %v111_v43 = vrot.slane %v2837_v31, 1  ;;  %v177_v44 = vrot.slane %v2835_v30, 2  ;;  %746 = vmatprep.subr.bf16.mxu0 %v2590_v56  ;;  %2352 = vmatprep.subr.bf16.mxu1 %v2593_v62  ;;  %v2901_v28 = vld [vmem:[#allocation2 + $0x80] sm:$0xff]  ;;  %v2598_v29 = vld [vmem:[#allocation4 + $0x4c] ss:$12 sps:$4 sm:$0xff]  }
  0x40   :  { %v178_v45 = vrot.slane %v2837_v31, 2  ;;  %v228_v48 = vsel %vm202_vm1, %v175_v40, %v176_v41  ;;  %v229_v49 = vsel %vm202_vm1, %v174_v21, %v175_v40  ;;  %v112_v50 = vrot.slane %v2845_v36, 1  ;;  %747 = vmatpush1.bf16.msra.mxu0 %v2592_v57  ;;  %2353 = vmatpush3.bf16.msra.mxu1 %v2593_v62  ;;  %v2600_v35 = vld [vmem:[#allocation4 + $0x48] ss:$12 sps:$4 sm:$0xff]   ;;  %v2604_v56 = vld [vmem:[#allocation4 + $0x30] ss:$12 sps:$4 sm:$0xff]  }
  0x41   :  { %v113_v51 = vrot.slane %v2847_v37, 1  ;;  %v161_v54 = vsel %vm137_vm0, %v110_v42, %v111_v43  ;;  %v162_v55 = vsel %vm137_vm0, %v109_v25, %v110_v42  ;;  %v2455_v58 = vpack.i.bf16 %v228_v48, %v229_v49  ;;  %748 = vmatprep.subr.bf16.mxu0 %v2594_v10  ;;  %v2597_v25 = vld [vmem:[#allocation4 + $0x68] ss:$12 sps:$4 sm:$0xff]  }
  0x42   :  { %2436 = vrot.lane.b32.xlu0 %v2435_v32, %s2740_s5  ;;  %2446 = vrot.lane.b32.xlu1 %v2445_v38, %s2740_s5  ;;  %v2460_v59 = vpack.i.bf16 %v161_v54, %v162_v55  ;;  %v226_v60 = vsel %vm202_vm1, %v177_v44, %v178_v45  ;;  %v227_v61 = vsel %vm202_vm1, %v176_v41, %v177_v44  ;;  %v179_v6 = vrot.slane %v2845_v36, 2  ;;  %v2601_v38 = vld [vmem:[#allocation4 + $0x50] ss:$12 sps:$4 sm:$0xff]   ;;  %v2915_v42 = vld [vmem:[#allocation2 + $0x88] sm:$0xff]  ;;  %v2605_v55 = vld [vmem:[#allocation4 + $0x38] ss:$12 sps:$4 sm:$0xff]  }
  0x43   :  { %v159_v63 = vsel %vm137_vm0, %v112_v50, %v113_v51  ;;  %v160_v0 = vsel %vm137_vm0, %v111_v43, %v112_v50  ;;  %v180_v7 = vrot.slane %v2847_v37, 2  ;;  %v114_v11 = vrot.slane %v2857_v46, 1  ;;  %2354 = vmatprep.subr.bf16.mxu1 %v2597_v25  ;;  %v2922_v49 = vld [vmem:[#allocation2 + $0x90] sm:$0xff]  ;;  %v2925_v54 = vld [vmem:[#allocation2 + $0x98] sm:$0xff] }
  0x44   :  { %v115_v14 = vrot.slane %v2859_v47, 1  ;;  %v181_v15 = vrot.slane %v2857_v46, 2  ;;  %v182_v16 = vrot.slane %v2859_v47, 2  ;;  %v225_v20 = vsel %vm202_vm1, %v178_v45, %v179_v6  ;;  %749 = vmatpush1.bf16.msra.mxu0 %v2596_v18  ;;  %2355 = vmatpush3.bf16.msra.mxu1 %v2597_v25  ;;  %v2602_v50 = vld [vmem:[#allocation4 + $0x34] ss:$12 sps:$4 sm:$0xff]  }
  0x45   :  { %v224_v19 = vsel %vm202_vm1, %v179_v6, %v180_v7  ;;  %v116_v21 = vrot.slane %v2867_v52, 1  ;;  %v117_v22 = vrot.slane %v2869_v53, 1  ;;  %v2465_v24 = vpack.i.bf16 %v226_v60, %v227_v61  ;;  %750 = vmatprep.subr.bf16.mxu0 %v2598_v29  ;;  %2356 = vmatprep.subr.bf16.mxu1 %v2601_v38  ;;  %v2928_v60 = vld [vmem:[#allocation2 + $0xa0] sm:$0xff]  ;;  %v2930_v61 = vld [vmem:[#allocation2 + $0xa8] sm:$0xff]  ;;  %v2954_v29 = vld [vmem:[#allocation2 + $0xb0] sm:$0xff] }
  0x46   :  { %2451 = vrot.lane.b32.xlu0 %v2450_v39, %s2743_s2  ;;  %2456 = vrot.lane.b32.xlu1 %v2455_v58, %s2740_s5  ;;  %v2470_v26 = vpack.i.bf16 %v159_v63, %v160_v0  ;;  %v2475_v27 = vpack.i.bf16 %v224_v19, %v225_v20  ;;  %v157_v32 = vsel %vm137_vm0, %v114_v11, %v115_v14  ;;  %v183_v43 = vrot.slane %v2867_v52, 2  ;;  %v2609_v18 = vld [vmem:[#allocation4 + $0x20] ss:$12 sps:$4 sm:$0xff]   ;;  %v2608_v20 = vld [vmem:[#allocation4 + $0x18] ss:$12 sps:$4 sm:$0xff]  }
  0x47   :  { %v158_v33 = vsel %vm137_vm0, %v113_v51, %v114_v11  ;;  %v222_v34 = vsel %vm202_vm1, %v181_v15, %v182_v16  ;;  %v223_v39 = vsel %vm202_vm1, %v180_v7, %v181_v15  ;;  %v155_v40 = vsel %vm137_vm0, %v116_v21, %v117_v22  ;;  %v2606_v7 = vld [vmem:[#allocation4 + $0x1c] ss:$12 sps:$4 sm:$0xff]  }
  0x48   :  { %v156_v41 = vsel %vm137_vm0, %v115_v14, %v116_v21  ;;  %v184_v44 = vrot.slane %v2869_v53, 2  ;;  %v118_v45 = vrot.slane %v2897_v23, 1  ;;  %v119_v48 = vrot.slane %v2901_v28, 1  ;;  %751 = vmatpush1.bf16.msra.mxu0 %v2600_v35  ;;  %2357 = vmatpush3.bf16.msra.mxu1 %v2601_v38  ;;  %v2964_v38 = vld [vmem:[#allocation2 + $0xb8] sm:$0xff] }
  0x49   :  { %v2480_v51 = vpack.i.bf16 %v157_v32, %v158_v33  ;;  %v2485_v57 = vpack.i.bf16 %v222_v34, %v223_v39  ;;  %v2490_v58 = vpack.i.bf16 %v155_v40, %v156_v41  ;;  %752 = vmatprep.subr.bf16.mxu0 %v2602_v50  ;;  %v221_v63 = vsel %vm202_vm1, %v182_v16, %v183_v43  ;;  %v2966_v39 = vld [vmem:[#allocation2 + $0xc0] sm:$0xff] }
  0x4a   :  { %2461 = vrot.lane.b32.xlu0 %v2460_v59, %s2743_s2  ;;  %2466 = vrot.lane.b32.xlu1 %v2465_v24, %s2740_s5  ;;  %v185_v59 = vrot.slane %v2897_v23, 2  ;;  %v220_v62 = vsel %vm202_vm1, %v183_v43, %v184_v44  ;;  %v186_v0 = vrot.slane %v2901_v28, 2  ;;  %v120_v6 = vrot.slane %v2915_v42, 1  ;;  %v2610_v40 = vld [vmem:[#allocation4 + $0x4] ss:$12 sps:$4 sm:$0xff]   ;;  %v2968_v43 = vld [vmem:[#allocation2 + $0xc8] sm:$0xff] }
  0x4b   :  { %2358 = vmatprep.subr.bf16.mxu1 %v2605_v55  ;;  %v153_v10 = vsel %vm137_vm0, %v118_v45, %v119_v48  ;;  %v154_v11 = vsel %vm137_vm0, %v117_v22, %v118_v45  ;;  %v121_v14 = vrot.slane %v2922_v49, 1  ;;  %v187_v15 = vrot.slane %v2915_v42, 2  ;;  %v2612_v41 = vld [vmem:[#allocation4] ss:$12 sps:$4 sm:$0xff]   ;;  %v2613_v45 = vld [vmem:[#allocation4 + $0x8] ss:$12 sps:$4 sm:$0xff]  }
  0x4c   :  { %v188_v16 = vrot.slane %v2922_v49, 2  ;;  %v122_v19 = vrot.slane %v2925_v54, 1  ;;  %753 = vmatpush1.bf16.msra.mxu0 %v2604_v56  ;;  %v2495_v21 = vpack.i.bf16 %v220_v62, %v221_v63  ;;  %v123_v24 = vrot.slane %v2928_v60, 1  ;;  %2359 = vmatpush3.bf16.msra.mxu1 %v2605_v55 }
  0x4d   :  { %v189_v25 = vrot.slane %v2925_v54, 2  ;;  %v2500_v22 = vpack.i.bf16 %v153_v10, %v154_v11  ;;  %v124_v32 = vrot.slane %v2930_v61, 1  ;;  %754 = vmatprep.subr.bf16.mxu0 %v2606_v7  ;;  %v219_v33 = vsel %vm202_vm1, %v184_v44, %v185_v59  ;;  %2360 = vmatprep.subr.bf16.mxu1 %v2609_v18  ;;  %v2988_v7 = vld [vmem:[#allocation2 + $0xd8] sm:$0xff]  ;;  %v2990_v10 = vld [vmem:[#allocation2 + $0xe0] sm:$0xff] }
  0x4e   :  { %2471 = vrot.lane.b32.xlu0 %v2470_v26, %s2743_s2  ;;  %2476 = vrot.lane.b32.xlu1 %v2475_v27, %s2740_s5  ;;  %v218_v26 = vsel %vm202_vm1, %v185_v59, %v186_v0  ;;  %v190_v27 = vrot.slane %v2928_v60, 2  ;;  %v151_v34 = vsel %vm137_vm0, %v120_v6, %v121_v14  ;;  %v152_v35 = vsel %vm137_vm0, %v119_v48, %v120_v6  ;;  %v2982_v59 = vld [vmem:[#allocation2 + $0xd0] sm:$0xff] }
  0x4f   :  { %v2505_v44 = vpack.i.bf16 %v218_v26, %v219_v33  ;;  %v2510_v50 = vpack.i.bf16 %v151_v34, %v152_v35  ;;  %v217_v48 = vsel %vm202_vm1, %v186_v0, %v187_v15  ;;  %v149_v55 = vsel %vm137_vm0, %v122_v19, %v123_v24 }
  0x50   :  { %755 = vmatpush1.bf16.msra.mxu0 %v2608_v20  ;;  %2361 = vmatpush3.bf16.msra.mxu1 %v2609_v18  ;;  %v150_v56 = vsel %vm137_vm0, %v121_v14, %v122_v19  ;;  %v192_v62 = vrot.slane %v2954_v29, 2  ;;  %v126_v63 = vrot.slane %v2964_v38, 1  ;;  %v127_v0 = vrot.slane %v2966_v39, 1 }
  0x51   :  { %756 = vmatprep.subr.bf16.mxu0 %v2610_v40  ;;  %v193_v6 = vrot.slane %v2964_v38, 2  ;;  %2362 = vmatprep.subr.bf16.mxu1 %v2613_v45  ;;  %v194_v11 = vrot.slane %v2966_v39, 2  ;;  %v128_v14 = vrot.slane %v2968_v43, 1  ;;  %v2520_v18 = vpack.i.bf16 %v149_v55, %v150_v56 }
  0x52   :  { %2481 = vrot.lane.b32.xlu0 %v2480_v51, %s2743_s2  ;;  %2486 = vrot.lane.b32.xlu1 %v2485_v57, %s2740_s5  ;;  %v216_v51 = vsel %vm202_vm1, %v187_v15, %v188_v16  ;;  %v125_v57 = vrot.slane %v2954_v29, 1  ;;  %v214_v19 = vsel %vm202_vm1, %v189_v25, %v190_v27  ;;  %v215_v20 = vsel %vm202_vm1, %v188_v16, %v189_v25 }
  0x53   :  { %v2515_v15 = vpack.i.bf16 %v216_v51, %v217_v48  ;;  %v129_v26 = vrot.slane %v2982_v59, 1  ;;  %v195_v33 = vrot.slane %v2968_v43, 2  ;;  %v196_v34 = vrot.slane %v2982_v59, 2 }
  0x54   :  { %757 = vmatpush1.bf16.msra.mxu0 %v2612_v41  ;;  %2363 = vmatpush3.bf16.msra.mxu1 %v2613_v45  ;;  %v130_v35 = vrot.slane %v2988_v7, 1  ;;  %v131_v40 = vrot.slane %v2990_v10, 1  ;;  %v2525_v41 = vpack.i.bf16 %v214_v19, %v215_v20  ;;  %v2744_v16 = vmov 0  }
  0x55   :  { %774 = vmatprep.mubr.bf16.mxu0 %v2744_v16  ;;  %v145_v45 = vsel %vm137_vm0, %v126_v63, %v127_v0  ;;  %v210_v48 = vsel %vm202_vm1, %v193_v6, %v194_v11  ;;  %v211_v55 = vsel %vm202_vm1, %v192_v62, %v193_v6  ;;  %v144_v56 = vsel %vm137_vm0, %v127_v0, %v128_v14 }
  0x56   :  { %2491 = vrot.lane.b32.xlu0 %v2490_v58, %s2743_s2  ;;  %2496 = vrot.lane.b32.xlu1 %v2495_v21, %s2740_s5  ;;  %v191_v58 = vrot.slane %v2930_v61, 2  ;;  %v147_v21 = vsel %vm137_vm0, %v124_v32, %v125_v57  ;;  %v208_v6 = vsel %vm202_vm1, %v195_v33, %v196_v34  ;;  %v209_v0 = vsel %vm202_vm1, %v194_v11, %v195_v33 }
  0x57   :  { %v142_v19 = vsel %vm137_vm0, %v129_v26, %v130_v35  ;;  %vm524_vm3 = vcmask 523264   ;;  %vm693_vm4 = vcmask 785408   ;;  %vm1830_vm6 = vcmask 1041409  }
  0x58   :  { %vm1832_vm7 = vcmask 1042434   ;;  %vm1834_vm9 = vcmask 1043459   ;;  %vm1836_vm10 = vcmask 1044484   ;;  %vm1838_vm11 = vcmask 1045509  }
  0x59   :  { %vm1840_vm12 = vcmask 1046534   ;;  %vm1842_vm13 = vcmask 1047559   ;;  %vm2746_vm14 = vmmov 0  }
  0x5a   :  { %2501 = vrot.lane.b32.xlu0 %v2500_v22, %s2743_s2  ;;  %2506 = vrot.lane.b32.xlu1 %v2505_v44, %s2740_s5  ;;  %v148_v22 = vsel %vm137_vm0, %v123_v24, %v124_v32  ;;  %v212_v24 = vsel %vm202_vm1, %v191_v58, %v192_v62  ;;  %v213_v32 = vsel %vm202_vm1, %v190_v27, %v191_v58  ;;  %v3030_v58 = vld [vmem:[#allocation2 + $0xe8] sm:$0xff] }
  0x5b   :  { %v2530_v25 = vpack.i.bf16 %v147_v21, %v148_v22  ;;  %v146_v44 = vsel %vm137_vm0, %v125_v57, %v126_v63  ;;  %v143_v27 = vsel %vm137_vm0, %v128_v14, %v129_v26  ;;  %v3032_v57 = vld [vmem:[#allocation2 + $0xf0] sm:$0xff]  ;;  %v2545_v63 = vpack.i.bf16 %v210_v48, %v211_v55  ;;  %v3048_v22 = vld [vmem:[#allocation2 + $0xf8] sm:$0xff] }
  0x5c   :  { %v2540_v51 = vpack.i.bf16 %v145_v45, %v146_v44  ;;  %v2550_v62 = vpack.i.bf16 %v143_v27, %v144_v56  ;;  %v141_v14 = vsel %vm137_vm0, %v130_v35, %v131_v40  ;;  %v132_v20 = vrot.slane %v3030_v58, 1 }
  0x5d   :  { %v133_v21 = vrot.slane %v3032_v57, 1  ;;  %v2560_v11 = vpack.i.bf16 %v141_v14, %v142_v19  ;;  %v199_v26 = vrot.slane %v3030_v58, 2  ;;  %v200_v35 = vrot.slane %v3032_v57, 2 }
  0x5e   :  { %2511 = vrot.lane.b32.xlu0 %v2510_v50, %s2743_s2  ;;  %2516 = vrot.lane.b32.xlu1 %v2515_v15, %s2740_s5  ;;  %v2535_v50 = vpack.i.bf16 %v212_v24, %v213_v32  ;;  %v197_v15 = vrot.slane %v2988_v7, 2  ;;  %v140_v32 = vsel %vm137_vm0, %v131_v40, %v132_v20  ;;  %v134_v45 = vrot.slane %v3048_v22, 1 }
  0x5f   :  { %v139_v24 = vsel %vm137_vm0, %v132_v20, %v133_v21  ;;  %v201_v48 = vrot.slane %v3048_v22, 2 }
  0x60   :  { %v207_v33 = vsel %vm202_vm1, %v196_v34, %v197_v15  ;;  %v204_v34 = vsel %vm202_vm1, %v199_v26, %v200_v35  ;;  %v138_v55 = vsel %vm137_vm0, %v133_v21, %v134_v45  ;;  %v169_v40 = vsel %vm137_vm0, %v134_v45, %v103_v5 }
  0x61   :  { %v2580_v56 = vpack.i.bf16 %v169_v40, %v138_v55 }
  0x62   :  { %2521 = vrot.lane.b32.xlu0 %v2520_v18, %s2743_s2  ;;  %2526 = vrot.lane.b32.xlu1 %v2525_v41, %s2740_s5  ;;  %v198_v18 = vrot.slane %v2990_v10, 2  ;;  %v2555_v41 = vpack.i.bf16 %v208_v6, %v209_v0 }
  0x66   :  { %2531 = vrot.lane.b32.xlu0 %v2530_v25, %s2743_s2  ;;  %2536 = vrot.lane.b32.xlu1 %v2535_v50, %s2740_s5  ;;  %v206_v25 = vsel %vm202_vm1, %v197_v15, %v198_v18  ;;  %v2570_v50 = vpack.i.bf16 %v139_v24, %v140_v32  ;;  %v234_v15 = vsel %vm202_vm1, %v201_v48, %v170_v17 }
  0x67   :  { %v2565_v44 = vpack.i.bf16 %v206_v25, %v207_v33 }
  0x6a   :  { %2541 = vrot.lane.b32.xlu0 %v2540_v51, %s2743_s2  ;;  %2546 = vrot.lane.b32.xlu1 %v2545_v63, %s2740_s5  ;;  %v205_v51 = vsel %vm202_vm1, %v198_v18, %v199_v26  ;;  %v203_v63 = vsel %vm202_vm1, %v200_v35, %v201_v48 }
  0x6b   :  { %v2575_v27 = vpack.i.bf16 %v204_v34, %v205_v51  ;;  %v2585_v18 = vpack.i.bf16 %v234_v15, %v203_v63 }
  0x6e   :  { %2551 = vrot.lane.b32.xlu0 %v2550_v62, %s2743_s2  ;;  %2556 = vrot.lane.b32.xlu1 %v2555_v41, %s2740_s5 }
  0x72   :  { %2561 = vrot.lane.b32.xlu0 %v2560_v11, %s2743_s2  ;;  %2566 = vrot.lane.b32.xlu1 %v2565_v44, %s2740_s5 }
  0x76   :  { %2571 = vrot.lane.b32.xlu0 %v2570_v50, %s2743_s2  ;;  %2576 = vrot.lane.b32.xlu1 %v2575_v27, %s2740_s5 }
  0x7a   :  { %2581 = vrot.lane.b32.xlu0 %v2580_v56, %s2743_s2  ;;  %2586 = vrot.lane.b32.xlu1 %v2585_v18, %s2740_s5 }
  0xb0   :  { %v2432_v5 = vpop.permute.xlu0 %2431  ;;  %v2442_v0 = vpop.permute.xlu1 %2441 }
  0xb1   :  { %v2434_v62 = vunpack.i.h.bf16 %v2432_v5  ;;  %v2433_v6 = vunpack.i.l.bf16 %v2432_v5  ;;  %v2444_v14 = vunpack.i.h.bf16 %v2442_v0  ;;  %v2443_v19 = vunpack.i.l.bf16 %v2442_v0 }
  0xb3   :  { %v493_v17 = vsel %vm491_vm2, %v2790_v3, %v2434_v62  ;;  %v492_v25 = vsel %vm491_vm2, %v2788_v2, %v2433_v6  ;;  %v495_v11 = vsel %vm491_vm2, %v2798_v8, %v2444_v14  ;;  %v494_v33 = vsel %vm491_vm2, %v2792_v4, %v2443_v19 }
  0xb4   :  { %v2437_v20 = vpop.permute.xlu0 %2436  ;;  %v2447_v24 = vpop.permute.xlu1 %2446 }
  0xb5   :  { %v2439_v21 = vunpack.i.h.bf16 %v2437_v20  ;;  %v2438_v41 = vunpack.i.l.bf16 %v2437_v20  ;;  %v2449_v45 = vunpack.i.h.bf16 %v2447_v24  ;;  %v2448_v44 = vunpack.i.l.bf16 %v2447_v24 }
  0xb7   :  { %v525_v26 = vsel %vm524_vm3, %v492_v25, %v2438_v41  ;;  %v526_v35 = vsel %vm524_vm3, %v493_v17, %v2439_v21  ;;  %v527_v2 = vsel %vm524_vm3, %v494_v33, %v2448_v44  ;;  %v528_v51 = vsel %vm524_vm3, %v495_v11, %v2449_v45 }
  0xb8   :  { %v557_v32 = vpack.c.bf16 %v526_v35, %v525_v26  ;;  %v2452_v50 = vpop.permute.xlu0 %2451  ;;  %v558_v4 = vpack.c.bf16 %v528_v51, %v527_v2  ;;  %v2457_v55 = vpop.permute.xlu1 %2456 }
  0xb9   :  { %v2454_v3 = vunpack.i.h.bf16 %v2452_v50  ;;  %v2453_v34 = vunpack.i.l.bf16 %v2452_v50  ;;  %v2459_v40 = vunpack.i.h.bf16 %v2457_v55  ;;  %v2458_v27 = vunpack.i.l.bf16 %v2457_v55 }
  0xba   :  { %2243 = vmatmul.mubr.msk.bf16.vlgmr.msra.gmra.mxu0 %vm693_vm4, %v557_v32  ;;  %2364 = vmatprep.mubr.msk.bf16.mxu1 %vm693_vm4, %v557_v32 }
  0xbb   :  { %v497_v8 = vsel %vm491_vm2, %v2809_v12, %v2454_v3  ;;  %v496_v48 = vsel %vm491_vm2, %v2800_v9, %v2453_v34  ;;  %784 = vmatprep.mubr.bf16.mxu0 %v2744_v16  ;;  %2365 = vmatmul.mubr.msk.bf16.vlgmr.msra.gmra.mxu1 %vm693_vm4, %v558_v4 }
  0xbc   :  { %v2462_v56 = vpop.permute.xlu0 %2461  ;;  %v529_v18 = vsel %vm524_vm3, %v496_v48, %v2458_v27  ;;  %v530_v5 = vsel %vm524_vm3, %v497_v8, %v2459_v40  ;;  %v2467_v6 = vpop.permute.xlu1 %2466 }
  0xbd   :  { %v2464_v63 = vunpack.i.h.bf16 %v2462_v56  ;;  %v2463_v15 = vunpack.i.l.bf16 %v2462_v56  ;;  %v559_v62 = vpack.c.bf16 %v530_v5, %v529_v18  ;;  %v2469_v0 = vunpack.i.h.bf16 %v2467_v6 }
  0xbe   :  { %v2468_v14 = vunpack.i.l.bf16 %v2467_v6 }
  0xbf   :  { %v499_v12 = vsel %vm491_vm2, %v2835_v30, %v2464_v63  ;;  %v498_v9 = vsel %vm491_vm2, %v2811_v13, %v2463_v15  ;;  %2368 = vmatprep.mubr.msk.bf16.mxu1 %vm693_vm4, %v559_v62 }
  0xc0   :  { %v2472_v19 = vpop.permute.xlu0 %2471  ;;  %v531_v41 = vsel %vm524_vm3, %v498_v9, %v2468_v14  ;;  %v532_v17 = vsel %vm524_vm3, %v499_v12, %v2469_v0  ;;  %v2477_v11 = vpop.permute.xlu1 %2476 }
  0xc1   :  { %v2474_v20 = vunpack.i.h.bf16 %v2472_v19  ;;  %v2473_v21 = vunpack.i.l.bf16 %v2472_v19  ;;  %v560_v25 = vpack.c.bf16 %v532_v17, %v531_v41  ;;  %v2479_v33 = vunpack.i.h.bf16 %v2477_v11 }
  0xc2   :  { %2244 = vmatmul.mubr.msk.bf16.gmra.mxu0 %vm693_vm4, %v558_v4  ;;  %v2478_v26 = vunpack.i.l.bf16 %v2477_v11 }
  0xc3   :  { %v501_v30 = vsel %vm491_vm2, %v2845_v36, %v2474_v20  ;;  %v500_v13 = vsel %vm491_vm2, %v2837_v31, %v2473_v21  ;;  %794 = vmatprep.mubr.bf16.mxu0 %v2744_v16  ;;  %2369 = vmatmul.mubr.msk.bf16.gmra.mxu1 %vm693_vm4, %v560_v25 }
  0xc4   :  { %v2482_v35 = vpop.permute.xlu0 %2481  ;;  %v533_v45 = vsel %vm524_vm3, %v500_v13, %v2478_v26  ;;  %v534_v44 = vsel %vm524_vm3, %v501_v30, %v2479_v33  ;;  %v2487_v3 = vpop.permute.xlu1 %2486 }
  0xc5   :  { %v2484_v24 = vunpack.i.h.bf16 %v2482_v35  ;;  %v2483_v32 = vunpack.i.l.bf16 %v2482_v35  ;;  %v3125_v50 = vpack.c.bf16 %v534_v44, %v533_v45  ;;  %v2489_v34 = vunpack.i.h.bf16 %v2487_v3 }
  0xc6   :  { %v2488_v2 = vunpack.i.l.bf16 %v2487_v3 }
  0xc7   :  { %v503_v36 = vsel %vm491_vm2, %v2857_v46, %v2484_v24  ;;  %v502_v31 = vsel %vm491_vm2, %v2847_v37, %v2483_v32  ;;  %2372 = vmatprep.mubr.msk.bf16.mxu1 %vm693_vm4, %v3125_v50 }
  0xc8   :  { %v2492_v51 = vpop.permute.xlu0 %2491  ;;  %v535_v48 = vsel %vm524_vm3, %v502_v31, %v2488_v2  ;;  %v536_v55 = vsel %vm524_vm3, %v503_v36, %v2489_v34  ;;  %v2497_v27 = vpop.permute.xlu1 %2496 }
  0xc9   :  { %v2494_v4 = vunpack.i.h.bf16 %v2492_v51  ;;  %v2493_v8 = vunpack.i.l.bf16 %v2492_v51  ;;  %v3136_v40 = vpack.c.bf16 %v536_v55, %v535_v48  ;;  %v2499_v56 = vunpack.i.h.bf16 %v2497_v27 }
  0xca   :  { %2245 = vmatmul.mubr.msk.bf16.gmra.mxu0 %vm693_vm4, %v559_v62  ;;  %v2498_v63 = vunpack.i.l.bf16 %v2497_v27 }
  0xcb   :  { %v505_v37 = vsel %vm491_vm2, %v2867_v52, %v2494_v4  ;;  %v504_v46 = vsel %vm491_vm2, %v2859_v47, %v2493_v8  ;;  %804 = vmatprep.mubr.bf16.mxu0 %v2744_v16  ;;  %2373 = vmatmul.mubr.msk.bf16.gmra.mxu1 %vm693_vm4, %v3136_v40 }
  0xcc   :  { %v2502_v15 = vpop.permute.xlu0 %2501  ;;  %v537_v62 = vsel %vm524_vm3, %v504_v46, %v2498_v63  ;;  %v538_v12 = vsel %vm524_vm3, %v505_v37, %v2499_v56  ;;  %v2507_v6 = vpop.permute.xlu1 %2506 }
  0xcd   :  { %v2504_v18 = vunpack.i.h.bf16 %v2502_v15  ;;  %v2503_v5 = vunpack.i.l.bf16 %v2502_v15  ;;  %v3147_v9 = vpack.c.bf16 %v538_v12, %v537_v62  ;;  %v2509_v0 = vunpack.i.h.bf16 %v2507_v6 }
  0xce   :  { %v2508_v14 = vunpack.i.l.bf16 %v2507_v6 }
  0xcf   :  { %v507_v47 = vsel %vm491_vm2, %v2897_v23, %v2504_v18  ;;  %v506_v52 = vsel %vm491_vm2, %v2869_v53, %v2503_v5  ;;  %2376 = vmatprep.mubr.msk.bf16.mxu1 %vm693_vm4, %v3147_v9 }
  0xd0   :  { %v2512_v19 = vpop.permute.xlu0 %2511  ;;  %v539_v41 = vsel %vm524_vm3, %v506_v52, %v2508_v14  ;;  %v540_v17 = vsel %vm524_vm3, %v507_v47, %v2509_v0  ;;  %v2517_v13 = vpop.permute.xlu1 %2516 }
  0xd1   :  { %v2514_v20 = vunpack.i.h.bf16 %v2512_v19  ;;  %v2513_v21 = vunpack.i.l.bf16 %v2512_v19  ;;  %v3158_v30 = vpack.c.bf16 %v540_v17, %v539_v41  ;;  %v2519_v11 = vunpack.i.h.bf16 %v2517_v13 }
  0xd2   :  { %2246 = vmatmul.mubr.msk.bf16.gmra.mxu0 %vm693_vm4, %v560_v25  ;;  %v2518_v33 = vunpack.i.l.bf16 %v2517_v13 }
  0xd3   :  { %v509_v53 = vsel %vm491_vm2, %v2915_v42, %v2514_v20  ;;  %v508_v23 = vsel %vm491_vm2, %v2901_v28, %v2513_v21  ;;  %814 = vmatprep.mubr.bf16.mxu0 %v2744_v16  ;;  %2377 = vmatmul.mubr.msk.bf16.gmra.mxu1 %vm693_vm4, %v3158_v30 }
  0xd4   :  { %v2522_v26 = vpop.permute.xlu0 %2521  ;;  %v541_v25 = vsel %vm524_vm3, %v508_v23, %v2518_v33  ;;  %v542_v32 = vsel %vm524_vm3, %v509_v53, %v2519_v11  ;;  %v2527_v44 = vpop.permute.xlu1 %2526 }
  0xd5   :  { %v2524_v35 = vunpack.i.h.bf16 %v2522_v26  ;;  %v2523_v24 = vunpack.i.l.bf16 %v2522_v26  ;;  %v3169_v45 = vpack.c.bf16 %v542_v32, %v541_v25  ;;  %v2529_v36 = vunpack.i.h.bf16 %v2527_v44 }
  0xd6   :  { %v2528_v31 = vunpack.i.l.bf16 %v2527_v44 }
  0xd7   :  { %v511_v28 = vsel %vm491_vm2, %v2925_v54, %v2524_v35  ;;  %v510_v42 = vsel %vm491_vm2, %v2922_v49, %v2523_v24  ;;  %2380 = vmatprep.mubr.msk.bf16.mxu1 %vm693_vm4, %v3169_v45 }
  0xd8   :  { %v2532_v3 = vpop.permute.xlu0 %2531  ;;  %v543_v51 = vsel %vm524_vm3, %v510_v42, %v2528_v31  ;;  %v544_v4 = vsel %vm524_vm3, %v511_v28, %v2529_v36  ;;  %v2537_v48 = vpop.permute.xlu1 %2536 }
  0xd9   :  { %v2534_v34 = vunpack.i.h.bf16 %v2532_v3  ;;  %v2533_v2 = vunpack.i.l.bf16 %v2532_v3  ;;  %v3181_v54 = vpack.c.bf16 %v544_v4, %v543_v51  ;;  %v2539_v55 = vunpack.i.h.bf16 %v2537_v48 }
  0xda   :  { %2247 = vmatmul.mubr.msk.bf16.gmra.mxu0 %vm693_vm4, %v3125_v50  ;;  %v2538_v37 = vunpack.i.l.bf16 %v2537_v48 }
  0xdb   :  { %v513_v49 = vsel %vm491_vm2, %v2930_v61, %v2534_v34  ;;  %v512_v8 = vsel %vm491_vm2, %v2928_v60, %v2533_v2  ;;  %824 = vmatprep.mubr.bf16.mxu0 %v2744_v16  ;;  %2381 = vmatmul.mubr.msk.bf16.gmra.mxu1 %vm693_vm4, %v3181_v54 }
  0xdc   :  { %v2542_v46 = vpop.permute.xlu0 %2541  ;;  %v545_v50 = vsel %vm524_vm3, %v512_v8, %v2538_v37  ;;  %v546_v63 = vsel %vm524_vm3, %v513_v49, %v2539_v55  ;;  %v2547_v18 = vpop.permute.xlu1 %2546 }
  0xdd   :  { %v2544_v27 = vunpack.i.h.bf16 %v2542_v46  ;;  %v2543_v56 = vunpack.i.l.bf16 %v2542_v46  ;;  %v3192_v15 = vpack.c.bf16 %v546_v63, %v545_v50  ;;  %v2549_v5 = vunpack.i.h.bf16 %v2547_v18 }
  0xde   :  { %v2548_v62 = vunpack.i.l.bf16 %v2547_v18 }
  0xdf   :  { %v515_v60 = vsel %vm491_vm2, %v2964_v38, %v2544_v27  ;;  %v514_v61 = vsel %vm491_vm2, %v2954_v29, %v2543_v56  ;;  %2384 = vmatprep.mubr.msk.bf16.mxu1 %vm693_vm4, %v3192_v15  ;;  %v1352_v56 = vsub.s32 4, %v2786_v1 }
  0xe0   :  { %v2552_v12 = vpop.permute.xlu0 %2551  ;;  %v547_v6 = vsel %vm524_vm3, %v514_v61, %v2548_v62  ;;  %v548_v0 = vsel %vm524_vm3, %v515_v60, %v2549_v5  ;;  %v2557_v19 = vpop.permute.xlu1 %2556 }
  0xe1   :  { %v2554_v47 = vunpack.i.h.bf16 %v2552_v12  ;;  %v2553_v52 = vunpack.i.l.bf16 %v2552_v12  ;;  %v568_v38 = vpack.c.bf16 %v548_v0, %v547_v6  ;;  %v2559_v20 = vunpack.i.h.bf16 %v2557_v19 }
  0xe2   :  { %2248 = vmatmul.mubr.msk.bf16.gmra.mxu0 %vm693_vm4, %v3136_v40  ;;  %v2558_v21 = vunpack.i.l.bf16 %v2557_v19 }
  0xe3   :  { %v517_v29 = vsel %vm491_vm2, %v2968_v43, %v2554_v47  ;;  %v516_v14 = vsel %vm491_vm2, %v2966_v39, %v2553_v52  ;;  %834 = vmatprep.mubr.bf16.mxu0 %v2744_v16  ;;  %2385 = vmatmul.mubr.msk.bf16.gmra.mxu1 %vm693_vm4, %v568_v38  ;;  %v3285_v52 = vadd.s32 8, %v2786_v1 }
  0xe4   :  { %v2562_v41 = vpop.permute.xlu0 %2561  ;;  %v549_v23 = vsel %vm524_vm3, %v516_v14, %v2558_v21  ;;  %v550_v40 = vsel %vm524_vm3, %v517_v29, %v2559_v20  ;;  %v2567_v11 = vpop.permute.xlu1 %2566 }
  0xe5   :  { %v2564_v17 = vunpack.i.h.bf16 %v2562_v41  ;;  %v2563_v53 = vunpack.i.l.bf16 %v2562_v41  ;;  %v569_v13 = vpack.c.bf16 %v550_v40, %v549_v23  ;;  %v2569_v33 = vunpack.i.h.bf16 %v2567_v11 }
  0xe6   :  { %v2568_v26 = vunpack.i.l.bf16 %v2567_v11  ;;  %vm1419_vm5 = vcmp.lt.s32.totalorder %v3285_v52, 15  ;;  %vm1669_vm8 = vcmp.lt.s32.totalorder %v3285_v52, 14 }
  0xe7   :  { %v519_v43 = vsel %vm491_vm2, %v2988_v7, %v2564_v17  ;;  %v518_v39 = vsel %vm491_vm2, %v2982_v59, %v2563_v53  ;;  %2388 = vmatprep.mubr.msk.bf16.mxu1 %vm693_vm4, %v569_v13 }
  0xe8   :  { %v2572_v35 = vpop.permute.xlu0 %2571  ;;  %v551_v32 = vsel %vm524_vm3, %v518_v39, %v2568_v26  ;;  %v552_v28 = vsel %vm524_vm3, %v519_v43, %v2569_v33  ;;  %v2577_v44 = vpop.permute.xlu1 %2576 }
  0xe9   :  { %v2574_v24 = vunpack.i.h.bf16 %v2572_v35  ;;  %v2573_v25 = vunpack.i.l.bf16 %v2572_v35  ;;  %v570_v42 = vpack.c.bf16 %v552_v28, %v551_v32  ;;  %v2579_v36 = vunpack.i.h.bf16 %v2577_v44 }
  0xea   :  { %2249 = vmatmul.mubr.msk.bf16.gmra.mxu0 %vm693_vm4, %v3147_v9  ;;  %v2578_v31 = vunpack.i.l.bf16 %v2577_v44 }
  0xeb   :  { %v521_v7 = vsel %vm491_vm2, %v3030_v58, %v2574_v24  ;;  %v520_v59 = vsel %vm491_vm2, %v2990_v10, %v2573_v25  ;;  %844 = vmatprep.mubr.bf16.mxu0 %v2744_v16  ;;  %2389 = vmatmul.mubr.msk.bf16.gmra.mxu1 %vm693_vm4, %v570_v42 }
  0xec   :  { %v2582_v3 = vpop.permute.xlu0 %2581  ;;  %v553_v51 = vsel %vm524_vm3, %v520_v59, %v2578_v31  ;;  %v554_v9 = vsel %vm524_vm3, %v521_v7, %v2579_v36  ;;  %v2587_v49 = vpop.permute.xlu1 %2586 }
  0xed   :  { %v2584_v34 = vunpack.i.h.bf16 %v2582_v3  ;;  %v2583_v2 = vunpack.i.l.bf16 %v2582_v3  ;;  %v571_v4 = vpack.c.bf16 %v554_v9, %v553_v51  ;;  %v2589_v8 = vunpack.i.h.bf16 %v2587_v49 }
  0xee   :  { %v2588_v48 = vunpack.i.l.bf16 %v2587_v49  ;;  %v2614_v49 = vld [vmem:[#allocation6 + $0x78] sm:$0xff]  }
  0xef   :  { %v523_v58 = vsel %vm491_vm2, %v3048_v22, %v2584_v34  ;;  %v522_v10 = vsel %vm491_vm2, %v3032_v57, %v2583_v2  ;;  %2392 = vmatprep.mubr.msk.bf16.mxu1 %vm693_vm4, %v571_v4  ;;  %v1100_v57 = vsub.s32 0, %v2786_v1  ;;  %v3259_v22 = vld [vmem:[#allocation7] sm:$0xff]  ;;  %2321 = vmatprep.subr.bf16.mxu1 %v2614_v49 }
  0xf0   :  { %v555_v55 = vsel %vm524_vm3, %v522_v10, %v2588_v48  ;;  %v556_v37 = vsel %vm524_vm3, %v523_v58, %v2589_v8  ;;  %v3277_v61 = vrot.slane %v3259_v22, %v1352_v56  ;;  %v2615_v8 = vld [vmem:[#allocation6 + $0x38] sm:$0xff]  }
  0xf1   :  { %v572_v46 = vpack.c.bf16 %v556_v37, %v555_v55  ;;  %2322 = vmatpush3.bf16.msra.mxu1 %v2615_v8 }
  0xf2   :  { %2250 = vmatmul.mubr.msk.bf16.gmra.mxu0 %vm693_vm4, %v3158_v30  ;;  %v1316_v30 = vsub.s32 1, %v2786_v1 }
  0xf3   :  { %854 = vmatprep.mubr.bf16.mxu0 %v2744_v16  ;;  %2393 = vmatmul.mubr.msk.bf16.gmra.mxu1 %vm693_vm4, %v572_v46 }
  0xf4   :  { %v3267_v27 = vrot.slane %v3259_v22, %v1316_v30 }
  0xfa   :  { %2251 = vmatmul.mubr.msk.bf16.gmra.mxu0 %vm693_vm4, %v3169_v45  ;;  %v3263_v45 = vrot.slane %v3259_v22, %v1100_v57 }
  0xfb   :  { %864 = vmatprep.mubr.bf16.mxu0 %v2744_v16 }
 0x102   :  { %2252 = vmatmul.mubr.msk.bf16.gmra.mxu0 %vm693_vm4, %v3181_v54  ;;  %v1136_v54 = vsub.s32 3, %v2786_v1 }
 0x103   :  { %874 = vmatprep.mubr.bf16.mxu0 %v2744_v16 }
 0x10a   :  { %2253 = vmatmul.mubr.msk.bf16.gmra.mxu0 %vm693_vm4, %v3192_v15 }
 0x10b   :  { %884 = vmatprep.mubr.bf16.mxu0 %v2744_v16 }
 0x112   :  { %2254 = vmatmul.mubr.msk.bf16.gmra.mxu0 %vm693_vm4, %v568_v38 }
 0x113   :  { %894 = vmatprep.mubr.bf16.mxu0 %v2744_v16 }
 0x11a   :  { %2255 = vmatmul.mubr.msk.bf16.gmra.mxu0 %vm693_vm4, %v569_v13 }
 0x11b   :  { %904 = vmatprep.mubr.bf16.mxu0 %v2744_v16 }
 0x122   :  { %2256 = vmatmul.mubr.msk.bf16.gmra.mxu0 %vm693_vm4, %v570_v42 }
 0x123   :  { %914 = vmatprep.mubr.bf16.mxu0 %v2744_v16 }
 0x12a   :  { %2257 = vmatmul.mubr.msk.bf16.gmra.mxu0 %vm693_vm4, %v571_v4 }
 0x12b   :  { %924 = vmatprep.mubr.bf16.mxu0 %v2744_v16  ;;  %v3271_v16 = vrot.slane %v3259_v22, %v1136_v54 }
 0x132   :  { %2258 = vmatmul.mubr.msk.bf16.gmra.mxu0 %vm693_vm4, %v572_v46 }
 0x17a   :  { %v776_v50 = vpop.f32.mrf.mxu0 }
 0x17b   :  { %v1102_v63 = vmul.f32 %v3263_v45, %v776_v50  ;;  %v3274_v60 = vpop.f32.mrf.mxu1 }
 0x17c   :  { %v778_v15 = vpop.f32.mrf.mxu0 }
 0x17d   :  { %v1318_v18 = vmul.f32 %v3267_v27, %v778_v15  ;;  %v1138_v62 = vadd.f32 %v3271_v16, %v1102_v63  ;;  %v3281_v12 = vpop.f32.mrf.mxu1 }
 0x17e   :  { %v780_v5 = vpop.f32.mrf.mxu0 }
 0x17f   :  { %v1103_v47 = vmul.f32 %v3263_v45, %v780_v5  ;;  %v3288_v38 = vpop.f32.mrf.mxu1  ;;  %v1354_v14 = vadd.f32 %v3277_v61, %v1318_v18  ;;  %v1170_v20 = vmax.f32 %v1138_v62, 0.0 }
 0x180   :  { %v782_v6 = vpop.f32.mrf.mxu0 }
 0x181   :  { %v1139_v0 = vadd.f32 %v3271_v16, %v1103_v47  ;;  %v1319_v29 = vmul.f32 %v3267_v27, %v782_v6  ;;  %v3293_v17 = vpop.f32.mrf.mxu1  ;;  %v1386_v13 = vmax.f32 %v1354_v14, 0.0  ;;  %v2616_v6 = vld [vmem:[#allocation6 + $0x70] sm:$0xff]  }
 0x182   :  { %v786_v19 = vpop.f32.mrf.mxu0  ;;  %2323 = vmatprep.subr.bf16.mxu1 %v2616_v6 }
 0x183   :  { %v1171_v21 = vmax.f32 %v1139_v0, 0.0  ;;  %v1355_v41 = vadd.f32 %v3277_v61, %v1319_v29  ;;  %v1104_v43 = vmul.f32 %v3263_v45, %v786_v19  ;;  %v3297_v39 = vpop.f32.mrf.mxu1  ;;  %v2617_v0 = vld [vmem:[#allocation6 + $0x30] sm:$0xff]  }
 0x184   :  { %v788_v53 = vpop.f32.mrf.mxu0  ;;  %2324 = vmatpush3.bf16.msra.mxu1 %v2617_v0 }
 0x185   :  { %v1202_v23 = vmax.f32 %v1170_v20, %v1171_v21  ;;  %v1387_v40 = vmax.f32 %v1355_v41, 0.0  ;;  %v1320_v25 = vmul.f32 %v3267_v27, %v788_v53  ;;  %v1140_v28 = vadd.f32 %v3271_v16, %v1104_v43  ;;  %v3303_v42 = vpop.f32.mrf.mxu1 }
 0x186   :  { %v790_v11 = vpop.f32.mrf.mxu0 }
 0x187   :  { %v1421_v33 = vsel %vm1419_vm5, %v1387_v40, 0.0  ;;  %v1203_v26 = vrot.slane %v1202_v23, 4  ;;  %v1105_v7 = vmul.f32 %v3263_v45, %v790_v11  ;;  %v1356_v34 = vadd.f32 %v3277_v61, %v1320_v25  ;;  %v3309_v4 = vpop.f32.mrf.mxu1 }
 0x188   :  { %v1452_v35 = vmax.f32 %v1386_v13, %v1421_v33  ;;  %v792_v24 = vpop.f32.mrf.mxu0  ;;  %v1172_v51 = vmax.f32 %v1140_v28, 0.0 }
 0x189   :  { %v1204_v44 = vmax.f32 %v1202_v23, %v1203_v26  ;;  %v1141_v36 = vadd.f32 %v3271_v16, %v1105_v7  ;;  %v1321_v31 = vmul.f32 %v3267_v27, %v792_v24  ;;  %v1388_v57 = vmax.f32 %v1356_v34, 0.0  ;;  %v3314_v50 = vpop.f32.mrf.mxu1  ;;  %v2619_v34 = vld [vmem:[#allocation6 + $0x28] sm:$0xff]  }
 0x18a   :  { %v1453_v32 = vrot.slane %v1452_v35, 4  ;;  %v796_v59 = vpop.f32.mrf.mxu0 }
 0x18b   :  { %v1173_v9 = vmax.f32 %v1141_v36, 0.0  ;;  %v1357_v58 = vadd.f32 %v3277_v61, %v1321_v31  ;;  %v1205_v48 = vrot.slane %v1204_v44, 2  ;;  %v3318_v19 = vpop.f32.mrf.mxu1  ;;  %v1106_v41 = vmul.f32 %v3263_v45, %v796_v59  ;;  %v2618_v31 = vld [vmem:[#allocation6 + $0x68] sm:$0xff]  }
 0x18c   :  { %v798_v3 = vpop.f32.mrf.mxu0  ;;  %v1454_v2 = vmax.f32 %v1452_v35, %v1453_v32  ;;  %2325 = vmatprep.subr.bf16.mxu1 %v2618_v31 }
 0x18d   :  { %v1209_v55 = vmax.f32 %v1172_v51, %v1173_v9  ;;  %v1389_v37 = vmax.f32 %v1357_v58, 0.0  ;;  %v1206_v18 = vmax.f32 %v1204_v44, %v1205_v48  ;;  %v3323_v33 = vpop.f32.mrf.mxu1  ;;  %v1142_v24 = vadd.f32 %v3271_v16, %v1106_v41  ;;  %2326 = vmatpush3.bf16.msra.mxu1 %v2619_v34 }
 0x18e   :  { %v800_v10 = vpop.f32.mrf.mxu0  ;;  %v1455_v30 = vrot.slane %v1454_v2, 2  ;;  %v1322_v25 = vmul.f32 %v3267_v27, %v798_v3 }
 0x18f   :  { %v1210_v54 = vrot.slane %v1209_v55, 4  ;;  %v1423_v56 = vsel %vm1419_vm5, %v1389_v37, 0.0  ;;  %v1207_v53 = vrot.slane %v1206_v18, 1  ;;  %v1107_v32 = vmul.f32 %v3263_v45, %v800_v10  ;;  %v3336_v9 = vpop.f32.mrf.mxu1 }
 0x190   :  { %v802_v46 = vpop.f32.mrf.mxu0  ;;  %v1459_v15 = vmax.f32 %v1388_v57, %v1423_v56  ;;  %v1456_v29 = vmax.f32 %v1454_v2, %v1455_v30  ;;  %v1174_v49 = vmax.f32 %v1142_v24, 0.0  ;;  %v1358_v8 = vadd.f32 %v3277_v61, %v1322_v25 }
 0x191   :  { %v1211_v5 = vmax.f32 %v1209_v55, %v1210_v54  ;;  %v1208_v28 = vmax.f32 %v1206_v18, %v1207_v53  ;;  %v1143_v36 = vadd.f32 %v3271_v16, %v1107_v32  ;;  %v1323_v3 = vmul.f32 %v3267_v27, %v802_v46  ;;  %v3349_v56 = vpop.f32.mrf.mxu1  ;;  %v2620_v18 = vld [vmem:[#allocation6 + $0x60] sm:$0xff]   ;;  %v2622_v32 = vld [vmem:[#allocation6 + $0x58] sm:$0xff]  }
 0x192   :  { %v806_v63 = vpop.f32.mrf.mxu0  ;;  %v1460_v47 = vrot.slane %v1459_v15, 4  ;;  %v1457_v43 = vrot.slane %v1456_v29, 1  ;;  %v1566_v54 = vsub.s32 2, %v2786_v1  ;;  %2327 = vmatprep.subr.bf16.mxu1 %v2620_v18 }
 0x193   :  { %v1212_v14 = vrot.slane %v1211_v5, 2  ;;  %v1175_v48 = vmax.f32 %v1143_v36, 0.0  ;;  %v1359_v55 = vadd.f32 %v3277_v61, %v1323_v3 }
 0x194   :  { %v3316_v62 = vpop.f32.mrf.mxu0  ;;  %v1461_v21 = vmax.f32 %v1459_v15, %v1460_v47  ;;  %v1458_v2 = vmax.f32 %v1456_v29, %v1457_v43  ;;  %v1390_v47 = vmax.f32 %v1358_v8, 0.0  ;;  %v1108_v29 = vmul.f32 %v3263_v45, %v806_v63 }
 0x195   :  { %v1213_v23 = vmax.f32 %v1211_v5, %v1212_v14  ;;  %v1216_v30 = vmax.f32 %v1174_v49, %v1175_v48  ;;  %v1391_v46 = vmax.f32 %v1359_v55, 0.0  ;;  %v2621_v5 = vld [vmem:[#allocation6 + $0x20] sm:$0xff]   ;;  %v3361_v53 = vrot.slane %v3259_v22, %v1566_v54 }
 0x196   :  { %v810_v20 = vpop.f32.mrf.mxu0  ;;  %v1462_v13 = vrot.slane %v1461_v21, 2  ;;  %2328 = vmatpush3.bf16.msra.mxu1 %v2621_v5  ;;  %v1324_v63 = vmul.f32 %v3267_v27, %v3316_v62 }
 0x197   :  { %v1214_v11 = vrot.slane %v1213_v23, 1  ;;  %v1217_v6 = vrot.slane %v1216_v30, 4  ;;  %v1425_v0 = vsel %vm1419_vm5, %v1391_v46, 0.0  ;;  %v1109_v24 = vmul.f32 %v3263_v45, %v810_v20  ;;  %2329 = vmatprep.subr.bf16.mxu1 %v2622_v32 }
 0x198   :  { %v3321_v40 = vpop.f32.mrf.mxu0  ;;  %v1463_v35 = vmax.f32 %v1461_v21, %v1462_v13  ;;  %v3358_v41 = vmax.f32 %v1390_v47, %v1425_v0  ;;  %v3364_v13 = vpop.f32.mrf.mxu1  ;;  %v1571_v36 = vmul.f32 %v3288_v38, %v3361_v53  ;;  %v1360_v3 = vadd.f32 %v3277_v61, %v1324_v63  ;;  %v2626_v0 = vld [vmem:[#allocation6 + $0x48] sm:$0xff]  }
 0x199   :  { %v1215_v7 = vmax.f32 %v1213_v23, %v1214_v11  ;;  %v1218_v21 = vmax.f32 %v1216_v30, %v1217_v6  ;;  %v1602_v23 = vsub.s32 5, %v2786_v1  ;;  %v1145_v34 = vadd.f32 %v3271_v16, %v1109_v24  ;;  %v2624_v6 = vld [vmem:[#allocation6 + $0x50] sm:$0xff]  }
 0x19a   :  { %v3325_v26 = vpop.f32.mrf.mxu0  ;;  %v1464_v44 = vrot.slane %v1463_v35, 1  ;;  %v3379_v31 = vpop.f32.mrf.mxu1  ;;  %v1325_v62 = vmul.f32 %v3267_v27, %v3321_v40  ;;  %v1569_v38 = vmul.f32 %v3361_v53, %v3293_v17  ;;  %v1570_v40 = vmul.f32 %v3274_v60, %v3361_v53  ;;  %v2625_v17 = vld [vmem:[#allocation6 + $0x10] sm:$0xff]  }
 0x19b   :  { %v3334_v51 = vsel %vm1830_vm6, %v1215_v7, %v1208_v28  ;;  %v1219_v11 = vrot.slane %v1218_v21, 2  ;;  %v2623_v28 = vld [vmem:[#allocation6 + $0x18] sm:$0xff]   ;;  %v1392_v47 = vmax.f32 %v1360_v3, 0.0 }
 0x19c   :  { %v3330_v59 = vpop.f32.mrf.mxu0  ;;  %v1465_v10 = vmax.f32 %v1463_v35, %v1464_v44  ;;  %v1144_v35 = vadd.f32 %v3271_v16, %v1108_v29  ;;  %v3375_v44 = vrot.slane %v3259_v22, %v1602_v23  ;;  %2330 = vmatpush3.bf16.msra.mxu1 %v2623_v28  ;;  %v1177_v22 = vmax.f32 %v1145_v34, 0.0  ;;  %v3395_v54 = vpop.f32.mrf.mxu1  ;;  %v2628_v34 = vld [vmem:[#allocation6 + $0x40] sm:$0xff]  }
 0x19d   :  { %v1220_v7 = vmax.f32 %v1218_v21, %v1219_v11  ;;  %v1361_v49 = vadd.f32 %v3277_v61, %v1325_v62  ;;  %v1568_v23 = vmul.f32 %v3361_v53, %v3281_v12  ;;  %2331 = vmatprep.subr.bf16.mxu1 %v2624_v6  ;;  %v1575_v12 = vmul.f32 %v3309_v4, %v3361_v53 }
 0x19e   :  { %v3339_v58 = vpop.f32.mrf.mxu0  ;;  %v3346_v57 = vsel %vm1830_vm6, %v1465_v10, %v1458_v2  ;;  %v1176_v10 = vmax.f32 %v1144_v35, 0.0  ;;  %v1607_v55 = vadd.f32 %v3375_v44, %v1571_v36  ;;  %v1605_v11 = vadd.f32 %v3375_v44, %v1569_v38  ;;  %v3413_v32 = vpop.f32.mrf.mxu1 }
 0x19f   :  { %v1221_v20 = vrot.slane %v1220_v7, 1  ;;  %v1393_v46 = vmax.f32 %v1361_v49, 0.0  ;;  %v1110_v36 = vmul.f32 %v3263_v45, %v3325_v26  ;;  %v1573_v62 = vmul.f32 %v3361_v53, %v3314_v50 }
 0x1a0   :  { %v3343_v37 = vpop.f32.mrf.mxu0  ;;  %v1223_v30 = vmax.f32 %v1176_v10, %v1177_v22  ;;  %v1639_v35 = vmax.f32 %v1607_v55, 0.0  ;;  %2332 = vmatpush3.bf16.msra.mxu1 %v2625_v17  ;;  %v1604_v10 = vadd.f32 %v3375_v44, %v1568_v23  ;;  %v1637_v22 = vmax.f32 %v1605_v11, 0.0  ;;  %v2629_v55 = vld [vmem:[#allocation6] sm:$0xff]  }
 0x1a1   :  { %v1222_v48 = vmax.f32 %v1220_v7, %v1221_v20  ;;  %v1427_v60 = vsel %vm1419_vm5, %v1393_v46, 0.0  ;;  %v2627_v7 = vld [vmem:[#allocation6 + $0x8] sm:$0xff]   ;;  %2333 = vmatprep.subr.bf16.mxu1 %v2626_v0  ;;  %v1574_v49 = vmul.f32 %v3297_v39, %v3361_v53  ;;  %v1572_v26 = vmul.f32 %v3361_v53, %v3303_v42 }
 0x1a2   :  { %v3351_v15 = vpop.f32.mrf.mxu0  ;;  %v1224_v29 = vrot.slane %v1223_v30, 4  ;;  %v3410_v63 = vmax.f32 %v1392_v47, %v1427_v60  ;;  %v1673_v4 = vsel %vm1669_vm8, %v1639_v35, 0.0  ;;  %v1146_v46 = vadd.f32 %v3271_v16, %v1110_v36 }
 0x1a3   :  { %v3401_v5 = vsel %vm1832_vm7, %v1222_v48, %v3334_v51  ;;  %v1606_v51 = vadd.f32 %v3375_v44, %v1570_v40  ;;  %v3433_v40 = vpop.f32.mrf.mxu1  ;;  %v1326_v39 = vmul.f32 %v3267_v27, %v3330_v59  ;;  %v1111_v47 = vmul.f32 %v3263_v45, %v3339_v58 }
 0x1a4   :  { %v3356_v14 = vpop.f32.mrf.mxu0  ;;  %v1225_v24 = vmax.f32 %v1223_v30, %v1224_v29  ;;  %2334 = vmatpush3.bf16.msra.mxu1 %v2627_v7  ;;  %v1611_v30 = vadd.f32 %v3375_v44, %v1575_v12  ;;  %v1609_v42 = vadd.f32 %v3375_v44, %v1573_v62  ;;  %v1636_v0 = vmax.f32 %v1604_v10, 0.0 }
 0x1a5   :  { %v1638_v38 = vmax.f32 %v1606_v51, 0.0  ;;  %2335 = vmatprep.subr.bf16.mxu1 %v2628_v34  ;;  %v1671_v29 = vsel %vm1669_vm8, %v1637_v22, 0.0  ;;  %v1610_v60 = vadd.f32 %v3375_v44, %v1574_v49  ;;  %v1147_v23 = vadd.f32 %v3271_v16, %v1111_v47  ;;  %v3451_v58 = vpop.f32.mrf.mxu1 }
 0x1a6   :  { %v3366_v43 = vpop.f32.mrf.mxu0  ;;  %v1226_v20 = vrot.slane %v1225_v24, 2  ;;  %v1608_v59 = vadd.f32 %v3375_v44, %v1572_v26  ;;  %v1327_v35 = vmul.f32 %v3267_v27, %v3343_v37  ;;  %v1643_v7 = vmax.f32 %v1611_v30, 0.0 }
 0x1a7   :  { %v1709_v11 = vmax.f32 %v1638_v38, %v1673_v4  ;;  %v1178_v12 = vmax.f32 %v1146_v46, 0.0  ;;  %v1362_v36 = vadd.f32 %v3277_v61, %v1326_v39  ;;  %v1179_v34 = vmax.f32 %v1147_v23, 0.0 }
 0x1a8   :  { %v3372_v25 = vpop.f32.mrf.mxu0  ;;  %v1227_v48 = vmax.f32 %v1225_v24, %v1226_v20  ;;  %2336 = vmatpush3.bf16.msra.mxu1 %v2629_v55  ;;  %v1702_v62 = vmax.f32 %v1636_v0, %v1671_v29  ;;  %v1641_v20 = vmax.f32 %v1609_v42, 0.0  ;;  %v1363_v22 = vadd.f32 %v3277_v61, %v1327_v35  ;;  %v3467_v55 = vpop.f32.mrf.mxu1 }
 0x1a9   :  { %v1642_v38 = vmax.f32 %v1610_v60, 0.0  ;;  %v1230_v37 = vmax.f32 %v1178_v12, %v1179_v34  ;;  %v1710_v4 = vrot.slane %v1709_v11, 4  ;;  %v1640_v26 = vmax.f32 %v1608_v59, 0.0 }
 0x1aa   :  { %v3384_v2 = vpop.f32.mrf.mxu0  ;;  %v1228_v6 = vrot.slane %v1227_v48, 1  ;;  %v1395_v30 = vmax.f32 %v1363_v22, 0.0  ;;  %v1577_v39 = vmul.f32 %v3361_v53, %v3349_v56  ;;  %v1394_v47 = vmax.f32 %v1362_v36, 0.0  ;;  %v1036_v12 = vpop.f32.mrf.mxu1 }
 0x1ab   :  { %v1231_v42 = vrot.slane %v1230_v37, 4  ;;  %v1675_v0 = vsel %vm1669_vm8, %v1641_v20, 0.0  ;;  %v1112_v29 = vmul.f32 %v3263_v45, %v3351_v15  ;;  %v1578_v23 = vmul.f32 %v3318_v19, %v3361_v53 }
 0x1ac   :  { %v3388_v8 = vpop.f32.mrf.mxu0  ;;  %v1229_v51 = vmax.f32 %v1227_v48, %v1228_v6  ;;  %v1579_v48 = vmul.f32 %v3336_v9, %v3361_v53  ;;  %v1703_v6 = vrot.slane %v1702_v62, 4  ;;  %v1429_v9 = vsel %vm1419_vm5, %v1395_v30, 0.0 }
 0x1ad   :  { %v1576_v56 = vmul.f32 %v3361_v53, %v3323_v33  ;;  %v1232_v59 = vmax.f32 %v1230_v37, %v1231_v42  ;;  %v1716_v15 = vmax.f32 %v1640_v26, %v1675_v0  ;;  %v1613_v34 = vadd.f32 %v3375_v44, %v1577_v39 }
 0x1ae   :  { %v3397_v18 = vpop.f32.mrf.mxu0  ;;  %v3460_v10 = vsel %vm1834_vm9, %v1229_v51, %v3401_v5  ;;  %v1677_v5 = vsel %vm1669_vm8, %v1643_v7, 0.0  ;;  %v3487_v51 = vmax.f32 %v1394_v47, %v1429_v9  ;;  %v1615_v7 = vadd.f32 %v3375_v44, %v1579_v48 }
 0x1af   :  { %v3489_v35 = vmax.f32 %v1642_v38, %v1677_v5  ;;  %v1233_v20 = vrot.slane %v1232_v59, 2  ;;  %v1328_v19 = vmul.f32 %v3267_v27, %v3356_v14  ;;  %v3497_v22 = vmax.f32 %v1709_v11, %v1710_v4  ;;  %v3510_v4 = vpop.f32.mrf.mxu1 }
 0x1b0   :  { %v3405_v21 = vpop.f32.mrf.mxu0  ;;  %v1467_v33 = vrot.slane %v3358_v41, 4  ;;  %v1148_v38 = vadd.f32 %v3271_v16, %v1112_v29  ;;  %v1113_v37 = vmul.f32 %v3263_v45, %v3366_v43  ;;  %v3505_v30 = vmax.f32 %v1702_v62, %v1703_v6 }
 0x1b1   :  { %4027 = vst [vmem:[#allocation13_spill] sm:$0xff] %v3489_v35  ;;  %4028 = vst [vmem:[#allocation14_spill] sm:$0xff] %v3497_v22  ;;  %v1614_v26 = vadd.f32 %v3375_v44, %v1578_v23  ;;  %v1612_v5 = vadd.f32 %v3375_v44, %v1576_v56  ;;  %v1234_v39 = vmax.f32 %v1232_v59, %v1233_v20  ;;  %v1647_v11 = vmax.f32 %v1615_v7, 0.0  ;;  %v3528_v1 = vpop.f32.mrf.mxu1 }
 0x1b2   :  { %v3415_v28 = vpop.f32.mrf.mxu0  ;;  %4029 = vst [vmem:[#allocation15_spill] sm:$0xff] %v3505_v30  ;;  %v1149_v47 = vadd.f32 %v3271_v16, %v1113_v37  ;;  %v1329_v42 = vmul.f32 %v3267_v27, %v3372_v25  ;;  %v1717_v0 = vrot.slane %v1716_v15, 4  ;;  %v1645_v62 = vmax.f32 %v1613_v34, 0.0 }
 0x1b3   :  { %v1235_v6 = vrot.slane %v1234_v39, 1  ;;  %v1364_v9 = vadd.f32 %v3277_v61, %v1328_v19  ;;  %v1468_v29 = vmax.f32 %v3358_v41, %v1467_v33  ;;  %v1180_v23 = vmax.f32 %v1148_v38, 0.0 }
 0x1b4   :  { %v3424_v3 = vpop.f32.mrf.mxu0  ;;  %v1181_v56 = vmax.f32 %v1149_v47, 0.0  ;;  %v1365_v59 = vadd.f32 %v3277_v61, %v1329_v42  ;;  %v1646_v20 = vmax.f32 %v1614_v26, 0.0  ;;  %v1644_v37 = vmax.f32 %v1612_v5, 0.0 }
 0x1b5   :  { %v1582_v25 = vmul.f32 %v3364_v13, %v3361_v53  ;;  %v1236_v14 = vmax.f32 %v1234_v39, %v1235_v6  ;;  %v1681_v34 = vsel %vm1669_vm8, %v1647_v11, 0.0  ;;  %v1583_v19 = vmul.f32 %v3395_v54, %v3361_v53 }
 0x1b6   :  { %v3435_v50 = vpop.f32.mrf.mxu0  ;;  %v1237_v41 = vmax.f32 %v1180_v23, %v1181_v56  ;;  %v1397_v33 = vmax.f32 %v1365_v59, 0.0  ;;  %v1679_v26 = vsel %vm1669_vm8, %v1645_v62, 0.0  ;;  %v1474_v5 = vrot.slane %v3410_v63, 4 }
 0x1b7   :  { %v3537_v13 = vsel %vm1836_vm10, %v1236_v14, %v3460_v10  ;;  %v1396_v39 = vmax.f32 %v1364_v9, 0.0  ;;  %v1469_v11 = vrot.slane %v1468_v29, 2  ;;  %v1587_v54 = vmul.f32 %v3467_v55, %v3361_v53 }
 0x1b8   :  { %v3444_v17 = vpop.f32.mrf.mxu0  ;;  %v1238_v47 = vrot.slane %v1237_v41, 4  ;;  %v1431_v42 = vsel %vm1419_vm5, %v1397_v33, 0.0  ;;  %v3546_v23 = vadd.f32 %v3375_v44, %v1582_v25  ;;  %v1586_v62 = vmul.f32 %v3433_v40, %v3361_v53  ;;  %v2387_v33 = vpop.f32.mrf.mxu1 }
 0x1b9   :  { %v1585_v10 = vmul.f32 %v3361_v53, %v1036_v12  ;;  %v3551_v14 = vmax.f32 %v1396_v39, %v1431_v42  ;;  %v3553_v9 = vmax.f32 %v1644_v37, %v1679_v26  ;;  %v1580_v55 = vmul.f32 %v3361_v53, %v3379_v31 }
 0x1ba   :  { %v3455_v24 = vpop.f32.mrf.mxu0  ;;  %4030 = vst [vmem:[#allocation16_spill] sm:$0xff] %v3546_v23  ;;  %v3558_v56 = vadd.f32 %v3375_v44, %v1583_v19  ;;  %v1239_v59 = vmax.f32 %v1237_v41, %v1238_v47  ;;  %v3562_v25 = vmax.f32 %v1716_v15, %v1717_v0  ;;  %v3564_v30 = vmax.f32 %v1646_v20, %v1681_v34 }
 0x1bb   :  { %4031 = vst [vmem:[#allocation17_spill] sm:$0xff] %v3553_v9  ;;  %v1475_v40 = vmax.f32 %v3410_v63, %v1474_v5  ;;  %v1114_v12 = vmul.f32 %v3263_v45, %v3384_v2  ;;  %v3569_v37 = vmax.f32 %v1468_v29, %v1469_v11  ;;  %v1581_v31 = vmul.f32 %v3361_v53, %v3413_v32  ;;  %v1052_v5 = vpop.f32.mrf.mxu1 }
 0x1bc   :  { %v3463_v49 = vpop.f32.mrf.mxu0  ;;  %4032 = vst [vmem:[#allocation18_spill] sm:$0xff] %v3562_v25  ;;  %4033 = vst [vmem:[#allocation19_spill] sm:$0xff] %v3564_v30  ;;  %v1623_v19 = vadd.f32 %v3375_v44, %v1587_v54  ;;  %v1240_v41 = vrot.slane %v1239_v59, 2  ;;  %v1622_v0 = vadd.f32 %v3375_v44, %v1586_v62  ;;  %v1584_v63 = vmul.f32 %v3361_v53, %v3451_v58 }
 0x1bd   :  { %v1621_v20 = vadd.f32 %v3375_v44, %v1585_v10  ;;  %v3583_v29 = vadd.f32 %v3375_v44, %v1580_v55  ;;  %v1651_v32 = vmax.f32 %v3558_v56, 0.0  ;;  %v1476_v11 = vrot.slane %v1475_v40, 2 }
 0x1be   :  { %v3469_v46 = vpop.f32.mrf.mxu0  ;;  %v1241_v34 = vmax.f32 %v1239_v59, %v1240_v41  ;;  %v1150_v54 = vadd.f32 %v3271_v16, %v1114_v12  ;;  %v1330_v47 = vmul.f32 %v3267_v27, %v3388_v8  ;;  %v1115_v58 = vmul.f32 %v3263_v45, %v3397_v18  ;;  %v2390_v18 = vpop.f32.mrf.mxu1 }
 0x1bf   :  { %4034 = vst [vmem:[#allocation20_spill] sm:$0xff] %v3583_v29  ;;  %v1471_v42 = vrot.slane %v3569_v37, 1  ;;  %v1617_v62 = vadd.f32 %v3375_v44, %v1581_v31  ;;  %v1655_v10 = vmax.f32 %v1623_v19, 0.0  ;;  %v1654_v59 = vmax.f32 %v1622_v0, 0.0 }
 0x1c0   :  { %v3481_v60 = vpop.f32.mrf.mxu0  ;;  %v1242_v55 = vrot.slane %v1241_v34, 1  ;;  %v1620_v41 = vadd.f32 %v3375_v44, %v1584_v63  ;;  %v1653_v2 = vmax.f32 %v1621_v20, 0.0  ;;  %v1151_v12 = vadd.f32 %v3271_v16, %v1115_v58 }
 0x1c1   :  { %v1481_v15 = vrot.slane %v3487_v51, 4  ;;  %v1589_v9 = vmul.f32 %v3361_v53, %v1052_v5  ;;  %v1331_v25 = vmul.f32 %v3267_v27, %v3405_v21  ;;  %v1477_v31 = vmax.f32 %v1475_v40, %v1476_v11 }
 0x1c2   :  { %v3492_v36 = vpop.f32.mrf.mxu0  ;;  %v1243_v8 = vmax.f32 %v1241_v34, %v1242_v55  ;;  %v1182_v19 = vmax.f32 %v1150_v54, 0.0  ;;  %v1366_v23 = vadd.f32 %v3277_v61, %v1330_v47  ;;  %v1183_v30 = vmax.f32 %v1151_v12, 0.0 }
 0x1c3   :  { %v1689_v63 = vsel %vm1669_vm8, %v1655_v10, 0.0  ;;  %v1590_v20 = vmul.f32 %v3510_v4, %v3361_v53  ;;  %v1367_v5 = vadd.f32 %v3277_v61, %v1331_v25  ;;  %v1652_v21 = vmax.f32 %v1620_v41, 0.0  ;;  %v1065_v10 = vpop.f32.mrf.mxu1 }
 0x1c4   :  { %v3503_v48 = vpop.f32.mrf.mxu0  ;;  %v3612_v34 = vsel %vm1838_vm11, %v1243_v8, %v3537_v13  ;;  %v1588_v40 = vmul.f32 %v3361_v53, %v3528_v1  ;;  %v1591_v11 = vmul.f32 %v2387_v33, %v3361_v53  ;;  %v3618_v54 = vmax.f32 %v1182_v19, %v1183_v30 }
 0x1c5   :  { %v1482_v47 = vmax.f32 %v3487_v51, %v1481_v15  ;;  %v1687_v58 = vsel %vm1669_vm8, %v1653_v2, 0.0  ;;  %v1625_v4 = vadd.f32 %v3375_v44, %v1589_v9  ;;  %v1399_v13 = vmax.f32 %v1367_v5, 0.0 }
 0x1c6   :  { %v3515_v43 = vpop.f32.mrf.mxu0  ;;  %v1478_v55 = vrot.slane %v1477_v31, 1  ;;  %v1649_v12 = vmax.f32 %v1617_v62, 0.0  ;;  %v1765_v25 = vmax.f32 %v1654_v59, %v1689_v63  ;;  %v1398_v41 = vmax.f32 %v1366_v23, 0.0 }
 0x1c7   :  { %v1626_v1 = vadd.f32 %v3375_v44, %v1590_v20  ;;  %v1488_v30 = vrot.slane %v3551_v14, 4  ;;  %v1433_v51 = vsel %vm1419_vm5, %v1399_v13, 0.0  ;;  %v1116_v33 = vmul.f32 %v3263_v45, %v3415_v28  ;;  %v2391_v20 = vpop.f32.mrf.mxu1 }
 0x1c8   :  { %v3520_v7 = vpop.f32.mrf.mxu0  ;;  %v1758_v15 = vmax.f32 %v1652_v21, %v1687_v58  ;;  %v1624_v9 = vadd.f32 %v3375_v44, %v1588_v40  ;;  %v1627_v2 = vadd.f32 %v3375_v44, %v1591_v11  ;;  %v3634_v62 = vmax.f32 %v1398_v41, %v1433_v51 }
 0x1c9   :  { %v3639_v59 = vsel %vm1669_vm8, %v1651_v32, 0.0  ;;  %v1483_v19 = vrot.slane %v1482_v47, 2  ;;  %v1657_v63 = vmax.f32 %v1625_v4, 0.0  ;;  %v3642_v5 = vmax.f32 %v3569_v37, %v1471_v42 }
 0x1ca   :  { %v3530_v38 = vpop.f32.mrf.mxu0  ;;  %4035 = vst [vmem:[#allocation21_spill] sm:$0xff] %v3639_v59  ;;  %v3646_v28 = vsel %vm1669_vm8, %v1649_v12, 0.0  ;;  %v1766_v21 = vrot.slane %v1765_v25, 4  ;;  %v1332_v40 = vmul.f32 %v3267_v27, %v3424_v3  ;;  %v3652_v58 = vmax.f32 %v1477_v31, %v1478_v55  ;;  %v1068_v3 = vpop.f32.mrf.mxu1 }
 0x1cb   :  { %4036 = vst [vmem:[#allocation22_spill] sm:$0xff] %v3646_v28  ;;  %v1489_v32 = vmax.f32 %v3551_v14, %v1488_v30  ;;  %v1152_v4 = vadd.f32 %v3271_v16, %v1116_v33  ;;  %v1117_v37 = vmul.f32 %v3263_v45, %v3435_v50  ;;  %v1759_v42 = vrot.slane %v1758_v15, 4 }
 0x1cc   :  { %v3543_v6 = vpop.f32.mrf.mxu0  ;;  %v1658_v13 = vmax.f32 %v1626_v1, 0.0  ;;  %v1656_v41 = vmax.f32 %v1624_v9, 0.0  ;;  %v1659_v12 = vmax.f32 %v1627_v2, 0.0  ;;  %v1484_v51 = vmax.f32 %v1482_v47, %v1483_v19 }
 0x1cd   :  { %v1691_v23 = vsel %vm1669_vm8, %v1657_v63, 0.0  ;;  %v1153_v59 = vadd.f32 %v3271_v16, %v1117_v37  ;;  %v1333_v31 = vmul.f32 %v3267_v27, %v3444_v17  ;;  %v3663_v14 = vmax.f32 %v1765_v25, %v1766_v21 }
 0x1ce   :  { %v3560_v35 = vpop.f32.mrf.mxu0  ;;  %v1594_v55 = vmul.f32 %v2390_v18, %v3361_v53  ;;  %v1593_v50 = vmul.f32 %v3361_v53, %v1068_v3  ;;  %v1368_v1 = vadd.f32 %v3277_v61, %v1332_v40  ;;  %v1490_v47 = vrot.slane %v1489_v32, 2 }
 0x1cf   :  { %4037 = vst [vmem:[#allocation23_spill] sm:$0xff] %v3663_v14  ;;  %v1184_v33 = vmax.f32 %v1152_v4, 0.0  ;;  %v1185_v9 = vmax.f32 %v1153_v59, 0.0  ;;  %v1369_v2 = vadd.f32 %v3277_v61, %v1333_v31  ;;  %v3671_v19 = vmax.f32 %v1758_v15, %v1759_v42 }
 0x1d0   :  { %v3574_v26 = vpop.f32.mrf.mxu0  ;;  %v1693_v17 = vsel %vm1669_vm8, %v1659_v12, 0.0  ;;  %v1772_v25 = vmax.f32 %v1656_v41, %v1691_v23  ;;  %v1595_v63 = vmul.f32 %v2391_v20, %v3361_v53  ;;  %v1485_v18 = vrot.slane %v1484_v51, 1 }
 0x1d1   :  { %4038 = vst [vmem:[#allocation24_spill] sm:$0xff] %v3671_v19  ;;  %v1592_v21 = vmul.f32 %v3361_v53, %v1065_v10  ;;  %v1251_v37 = vmax.f32 %v1184_v33, %v1185_v9  ;;  %v1401_v40 = vmax.f32 %v1369_v2, 0.0  ;;  %v1245_v3 = vrot.slane %v3618_v54, 4 }
 0x1d2   :  { %v3586_v39 = vpop.f32.mrf.mxu0  ;;  %v1629_v4 = vadd.f32 %v3375_v44, %v1593_v50  ;;  %v1400_v59 = vmax.f32 %v1368_v1, 0.0  ;;  %v1118_v15 = vmul.f32 %v3263_v45, %v3455_v24  ;;  %v3683_v31 = vmax.f32 %v1658_v13, %v1693_v17  ;;  %v2394_v17 = vpop.f32.mrf.mxu1 }
 0x1d3   :  { %v1491_v23 = vmax.f32 %v1489_v32, %v1490_v47  ;;  %v3686_v20 = vadd.f32 %v3375_v44, %v1594_v55  ;;  %v1435_v10 = vsel %vm1419_vm5, %v1401_v40, 0.0  ;;  %v1773_v12 = vrot.slane %v1772_v25, 4 }
 0x1d4   :  { %v3595_v56 = vpop.f32.mrf.mxu0  ;;  %v1631_v50 = vadd.f32 %v3375_v44, %v1595_v63  ;;  %v3692_v1 = vmax.f32 %v1400_v59, %v1435_v10  ;;  %v1628_v24 = vadd.f32 %v3375_v44, %v1592_v21  ;;  %v1154_v33 = vadd.f32 %v3271_v16, %v1118_v15 }
 0x1d5   :  { %v1334_v32 = vmul.f32 %v3267_v27, %v3463_v49  ;;  %v1119_v13 = vmul.f32 %v3263_v45, %v3469_v46  ;;  %v3700_v55 = vmax.f32 %v1484_v51, %v1485_v18  ;;  %v1246_v9 = vmax.f32 %v3618_v54, %v1245_v3 }
 0x1d6   :  { %v3604_v0 = vpop.f32.mrf.mxu0  ;;  %v1661_v2 = vmax.f32 %v1629_v4, 0.0  ;;  %v1492_v40 = vrot.slane %v1491_v23, 1  ;;  %v3709_v15 = vmax.f32 %v1772_v25, %v1773_v12  ;;  %v1663_v46 = vmax.f32 %v1631_v50, 0.0 }
 0x1d7   :  { %v1155_v49 = vadd.f32 %v3271_v16, %v1119_v13  ;;  %v1598_v51 = vmul.f32 %v2394_v17, %v3361_v53  ;;  %v1335_v18 = vmul.f32 %v3267_v27, %v3481_v60  ;;  %v1660_v54 = vmax.f32 %v1628_v24, 0.0  ;;  %v1081_v13 = vpop.f32.mrf.mxu1 }
 0x1d8   :  { %v3624_v8 = vpop.f32.mrf.mxu0  ;;  %v1186_v3 = vmax.f32 %v1154_v33, 0.0  ;;  %v1370_v4 = vadd.f32 %v3277_v61, %v1334_v32  ;;  %v1247_v47 = vrot.slane %v1246_v9, 2  ;;  %v1495_v41 = vrot.slane %v3634_v62, 4 }
 0x1d9   :  { %v1187_v10 = vmax.f32 %v1155_v49, 0.0  ;;  %v1695_v21 = vsel %vm1669_vm8, %v1661_v2, 0.0  ;;  %v1371_v25 = vadd.f32 %v3277_v61, %v1335_v18  ;;  %v3721_v50 = vmax.f32 %v1491_v23, %v1492_v40 }
 0x1da   :  { %v3650_v11 = vpop.f32.mrf.mxu0  ;;  %v1596_v60 = vmul.f32 %v3361_v53, %v1081_v13  ;;  %v1252_v24 = vrot.slane %v1251_v37, 4  ;;  %v3726_v32 = vsel %vm1669_vm8, %v1663_v46, 0.0  ;;  %v3729_v17 = vadd.f32 %v3375_v44, %v1598_v51 }
 0x1db   :  { %v1258_v33 = vmax.f32 %v1186_v3, %v1187_v10  ;;  %v1403_v49 = vmax.f32 %v1371_v25, 0.0  ;;  %v1120_v2 = vmul.f32 %v3263_v45, %v3492_v36  ;;  %v3733_v18 = vmax.f32 %v1660_v54, %v1695_v21  ;;  %v2395_v10 = vpop.f32.mrf.mxu1 }
 0x1dc   :  { %v3668_v30 = vpop.f32.mrf.mxu0  ;;  %v1402_v59 = vmax.f32 %v1370_v4, 0.0  ;;  %v1336_v40 = vmul.f32 %v3267_v27, %v3503_v48  ;;  %v1248_v13 = vmax.f32 %v1246_v9, %v1247_v47  ;;  %v1496_v3 = vmax.f32 %v3634_v62, %v1495_v41 }
 0x1dd   :  { %v1259_v23 = vrot.slane %v1258_v33, 4  ;;  %v1437_v46 = vsel %vm1419_vm5, %v1403_v49, 0.0  ;;  %v1121_v51 = vmul.f32 %v3263_v45, %v3515_v43  ;;  %v3745_v36 = vadd.f32 %v3375_v44, %v1596_v60  ;;  %v1084_v22 = vpop.f32.mrf.mxu1 }
 0x1de   :  { %v3681_v42 = vpop.f32.mrf.mxu0  ;;  %v1253_v21 = vmax.f32 %v1251_v37, %v1252_v24  ;;  %v1599_v54 = vmul.f32 %v2395_v10, %v3361_v53  ;;  %v1508_v4 = vmax.f32 %v1402_v59, %v1437_v46  ;;  %v1156_v48 = vadd.f32 %v3271_v16, %v1120_v2 }
 0x1df   :  { %v1157_v62 = vadd.f32 %v3271_v16, %v1121_v51  ;;  %v1337_v41 = vmul.f32 %v3267_v27, %v3520_v7  ;;  %v1122_v47 = vmul.f32 %v3263_v45, %v3530_v38  ;;  %v1260_v43 = vmax.f32 %v1258_v33, %v1259_v23 }
 0x1e0   :  { %v3704_v63 = vpop.f32.mrf.mxu0  ;;  %v1509_v9 = vrot.slane %v1508_v4, 4  ;;  %v1372_v49 = vadd.f32 %v3277_v61, %v1336_v40  ;;  %v1123_v37 = vmul.f32 %v3263_v45, %v3560_v35  ;;  %v1249_v60 = vrot.slane %v1248_v13, 1 }
 0x1e1   :  { %v1497_v24 = vrot.slane %v1496_v3, 2  ;;  %v1189_v59 = vmax.f32 %v1157_v62, 0.0  ;;  %v1373_v2 = vadd.f32 %v3277_v61, %v1337_v41  ;;  %v3762_v7 = vadd.f32 %v3375_v44, %v1599_v54 }
 0x1e2   :  { %v3719_v12 = vpop.f32.mrf.mxu0  ;;  %v1502_v38 = vrot.slane %v3692_v1, 4  ;;  %v1159_v33 = vadd.f32 %v3271_v16, %v1123_v37  ;;  %v1254_v23 = vrot.slane %v1253_v21, 2  ;;  %v1188_v40 = vmax.f32 %v1156_v48, 0.0 }
 0x1e3   :  { %v1405_v51 = vmax.f32 %v1373_v2, 0.0  ;;  %v1158_v35 = vadd.f32 %v3271_v16, %v1122_v47  ;;  %v1261_v62 = vrot.slane %v1260_v43, 2  ;;  %v1510_v29 = vmax.f32 %v1508_v4, %v1509_v9 }
 0x1e4   :  { %v3742_v25 = vpop.f32.mrf.mxu0  ;;  %v1404_v41 = vmax.f32 %v1372_v49, 0.0  ;;  %v1338_v28 = vmul.f32 %v3267_v27, %v3543_v6  ;;  %v1265_v46 = vmax.f32 %v1188_v40, %v1189_v59  ;;  %v1191_v19 = vmax.f32 %v1159_v33, 0.0 }
 0x1e5   :  { %v1439_v54 = vsel %vm1419_vm5, %v1405_v51, 0.0  ;;  %v1339_v37 = vmul.f32 %v3267_v27, %v3574_v26  ;;  %v3775_v48 = vmax.f32 %v1248_v13, %v1249_v60  ;;  %v3777_v47 = vmax.f32 %v1496_v3, %v1497_v24 }
 0x1e6   :  { %v3758_v10 = vpop.f32.mrf.mxu0  ;;  %v1515_v2 = vmax.f32 %v1404_v41, %v1439_v54  ;;  %v1124_v4 = vmul.f32 %v3263_v45, %v3586_v39  ;;  %v1503_v6 = vmax.f32 %v3692_v1, %v1502_v38  ;;  %v1597_v9 = vmul.f32 %v3361_v53, %v1084_v22 }
 0x1e7   :  { %v1190_v49 = vmax.f32 %v1158_v35, 0.0  ;;  %v1375_v59 = vadd.f32 %v3277_v61, %v1339_v37  ;;  %v1255_v33 = vmax.f32 %v1253_v21, %v1254_v23  ;;  %v1511_v40 = vrot.slane %v1510_v29, 2 }
 0x1e8   :  { %v3773_v14 = vpop.f32.mrf.mxu0  ;;  %v1374_v26 = vadd.f32 %v3277_v61, %v1338_v28  ;;  %v1125_v13 = vmul.f32 %v3263_v45, %v3604_v0  ;;  %v1262_v3 = vmax.f32 %v1260_v43, %v1261_v62  ;;  %v1266_v60 = vrot.slane %v1265_v46, 4 }
 0x1e9   :  { %v1272_v24 = vmax.f32 %v1190_v49, %v1191_v19  ;;  %v1407_v51 = vmax.f32 %v1375_v59, 0.0  ;;  %v1516_v39 = vrot.slane %v1515_v2, 4  ;;  %v1160_v1 = vadd.f32 %v3271_v16, %v1124_v4 }
 0x1ea   :  { %v3787_v41 = vpop.f32.mrf.mxu0  ;;  %v1340_v53 = vmul.f32 %v3267_v27, %v3595_v56  ;;  %v1161_v22 = vadd.f32 %v3271_v16, %v1125_v13  ;;  %v1504_v21 = vrot.slane %v1503_v6, 2  ;;  %v3794_v28 = vadd.f32 %v3375_v44, %v1597_v9 }
 0x1eb   :  { %v1441_v0 = vsel %vm1419_vm5, %v1407_v51, 0.0  ;;  %v1341_v19 = vmul.f32 %v3267_v27, %v3624_v8  ;;  %v1256_v43 = vrot.slane %v1255_v33, 1  ;;  %v1512_v38 = vmax.f32 %v1510_v29, %v1511_v40 }
 0x1ec   :  { %v1406_v23 = vmax.f32 %v1374_v26, 0.0  ;;  %v1193_v35 = vmax.f32 %v1161_v22, 0.0  ;;  %v1263_v62 = vrot.slane %v1262_v3, 1  ;;  %v1267_v54 = vmax.f32 %v1265_v46, %v1266_v60  ;;  %v3801_v4 = vpop.f32.mrf.mxu0 }
 0x1ed   :  { %v1273_v37 = vrot.slane %v1272_v24, 4  ;;  %v1377_v56 = vadd.f32 %v3277_v61, %v1341_v19  ;;  %v1517_v49 = vmax.f32 %v1515_v2, %v1516_v39  ;;  %v1192_v9 = vmax.f32 %v1160_v1, 0.0 }
 0x1ee   :  { %v1522_v44 = vmax.f32 %v1406_v23, %v1441_v0  ;;  %v1376_v59 = vadd.f32 %v3277_v61, %v1340_v53  ;;  %v1126_v29 = vmul.f32 %v3263_v45, %v3650_v11  ;;  %v3808_v40 = vmax.f32 %v1503_v6, %v1504_v21  ;;  %v920_v22 = vpop.f32.mrf.mxu0 }
 0x1ef   :  { %v1409_v51 = vmax.f32 %v1377_v56, 0.0  ;;  %v1513_v46 = vrot.slane %v1512_v38, 1  ;;  %v1279_v26 = vmax.f32 %v1192_v9, %v1193_v35  ;;  %v1342_v60 = vmul.f32 %v3267_v27, %v3668_v30 }
 0x1f0   :  { %v3812_v2 = vmax.f32 %v1255_v33, %v1256_v43  ;;  %v1268_v39 = vrot.slane %v1267_v54, 2  ;;  %v1274_v1 = vmax.f32 %v1272_v24, %v1273_v37  ;;  %v3816_v0 = vmax.f32 %v1262_v3, %v1263_v62 }
 0x1f1   :  { %v1443_v53 = vsel %vm1419_vm5, %v1409_v51, 0.0  ;;  %v1518_v19 = vrot.slane %v1517_v49, 2  ;;  %v1523_v23 = vrot.slane %v1522_v44, 4  ;;  %v1408_v11 = vmax.f32 %v1376_v59, 0.0  ;;  %v922_v59 = vpop.f32.mrf.mxu0 }
 0x1f2   :  { %v1162_v6 = vadd.f32 %v3271_v16, %v1126_v29  ;;  %v1127_v21 = vmul.f32 %v3263_v45, %v3681_v42  ;;  %v1343_v30 = vmul.f32 %v3267_v27, %v3704_v63  ;;  %v1128_v33 = vmul.f32 %v3263_v45, %v3719_v12 }
 0x1f3   :  { %v3825_v24 = vmax.f32 %v1512_v38, %v1513_v46  ;;  %v1280_v43 = vrot.slane %v1279_v26, 4  ;;  %v1529_v35 = vmax.f32 %v1408_v11, %v1443_v53  ;;  %v1378_v3 = vadd.f32 %v3277_v61, %v1342_v60 }
 0x1f4   :  { %v1269_v62 = vmax.f32 %v1267_v54, %v1268_v39  ;;  %v1275_v37 = vrot.slane %v1274_v1, 2  ;;  %v1163_v56 = vadd.f32 %v3271_v16, %v1127_v21  ;;  %v1379_v9 = vadd.f32 %v3277_v61, %v1343_v30  ;;  %v926_v30 = vpop.f32.mrf.mxu0 }
 0x1f5   :  { %v1519_v42 = vmax.f32 %v1517_v49, %v1518_v19  ;;  %v1164_v51 = vadd.f32 %v3271_v16, %v1128_v33  ;;  %v1344_v63 = vmul.f32 %v3267_v27, %v3742_v25  ;;  %v1129_v12 = vmul.f32 %v3263_v45, %v3758_v10 }
 0x1f6   :  { %v1524_v38 = vmax.f32 %v1522_v44, %v1523_v23  ;;  %v1194_v29 = vmax.f32 %v1162_v6, 0.0  ;;  %v1195_v46 = vmax.f32 %v1163_v56, 0.0  ;;  %v1411_v60 = vmax.f32 %v1379_v9, 0.0  ;;  %v928_v8 = vpop.f32.mrf.mxu0 }
 0x1f7   :  { %v1281_v54 = vmax.f32 %v1279_v26, %v1280_v43  ;;  %v1530_v39 = vrot.slane %v1529_v35, 4  ;;  %v1410_v53 = vmax.f32 %v1378_v3, 0.0  ;;  %v1165_v11 = vadd.f32 %v3271_v16, %v1129_v12 }
 0x1f8   :  { %v1286_v21 = vmax.f32 %v1194_v29, %v1195_v46  ;;  %v1445_v49 = vsel %vm1419_vm5, %v1411_v60, 0.0  ;;  %v1380_v19 = vadd.f32 %v3277_v61, %v1344_v63  ;;  %v1345_v25 = vmul.f32 %v3267_v27, %v3773_v14 }
 0x1f9   :  { %v1270_v10 = vrot.slane %v1269_v62, 1  ;;  %v1536_v44 = vmax.f32 %v1410_v53, %v1445_v49  ;;  %v1196_v23 = vmax.f32 %v1164_v51, 0.0  ;;  %v1197_v6 = vmax.f32 %v1165_v11, 0.0 }
 0x1fa   :  { %v1276_v33 = vmax.f32 %v1274_v1, %v1275_v37  ;;  %v1287_v26 = vrot.slane %v1286_v21, 4  ;;  %v1381_v43 = vadd.f32 %v3277_v61, %v1345_v25  ;;  %v1130_v3 = vmul.f32 %v3263_v45, %v3787_v41 }
 0x1fb   :  { %v1520_v56 = vrot.slane %v1519_v42, 1  ;;  %v1525_v9 = vrot.slane %v1524_v38, 2  ;;  %v1537_v12 = vrot.slane %v1536_v44, 4  ;;  %v1293_v29 = vmax.f32 %v1196_v23, %v1197_v6 }
 0x1fc   :  { %v1282_v63 = vrot.slane %v1281_v54, 2  ;;  %v1531_v46 = vmax.f32 %v1529_v35, %v1530_v39  ;;  %v1412_v60 = vmax.f32 %v1380_v19, 0.0  ;;  %v1413_v14 = vmax.f32 %v1381_v43, 0.0 }
 0x1fd   :  { %v1288_v13 = vmax.f32 %v1286_v21, %v1287_v26  ;;  %v1538_v53 = vmax.f32 %v1536_v44, %v1537_v12  ;;  %v1346_v1 = vmul.f32 %v3267_v27, %v3801_v4  ;;  %v1131_v37 = vmul.f32 %v3263_v45, %v920_v22 }
 0x1fe   :  { %v3847_v51 = vmax.f32 %v1269_v62, %v1270_v10  ;;  %v1277_v11 = vrot.slane %v1276_v33, 1  ;;  %v1447_v41 = vsel %vm1419_vm5, %v1413_v14, 0.0  ;;  %v1166_v49 = vadd.f32 %v3271_v16, %v1130_v3  ;;  %v930_v62 = vpop.f32.mrf.mxu0 }
 0x1ff   :  { %v3852_v25 = vmax.f32 %v1519_v42, %v1520_v56  ;;  %v3854_v35 = vmax.f32 %v1524_v38, %v1525_v9  ;;  %v1294_v39 = vrot.slane %v1293_v29, 4  ;;  %v1543_v21 = vmax.f32 %v1412_v60, %v1447_v41 }
 0x200   :  { %v3856_v19 = vmax.f32 %v1281_v54, %v1282_v63  ;;  %v1532_v44 = vrot.slane %v1531_v46, 2  ;;  %v1167_v4 = vadd.f32 %v3271_v16, %v1131_v37  ;;  %v1347_v22 = vmul.f32 %v3267_v27, %v922_v59  ;;  %v932_v37 = vpop.f32.mrf.mxu0 }
 0x201   :  { %v1289_v10 = vrot.slane %v1288_v13, 2  ;;  %v1539_v23 = vrot.slane %v1538_v53, 2  ;;  %v1544_v6 = vrot.slane %v1543_v21, 4  ;;  %v1382_v26 = vadd.f32 %v3277_v61, %v1346_v1 }
 0x202   :  { %v1198_v43 = vmax.f32 %v1166_v49, 0.0  ;;  %v1199_v42 = vmax.f32 %v1167_v4, 0.0  ;;  %v1383_v38 = vadd.f32 %v3277_v61, %v1347_v22  ;;  %v1132_v3 = vmul.f32 %v3263_v45, %v926_v30 }
 0x203   :  { %v3863_v56 = vmax.f32 %v1276_v33, %v1277_v11  ;;  %v1527_v54 = vrot.slane %v3854_v35, 1  ;;  %v1295_v9 = vmax.f32 %v1293_v29, %v1294_v39  ;;  %v1348_v12 = vmul.f32 %v3267_v27, %v928_v8 }
 0x204   :  { %v3867_v59 = vmax.f32 %v1531_v46, %v1532_v44  ;;  %v1545_v63 = vmax.f32 %v1543_v21, %v1544_v6  ;;  %v1300_v60 = vmax.f32 %v1198_v43, %v1199_v42  ;;  %v1415_v14 = vmax.f32 %v1383_v38, 0.0 }
 0x205   :  { %v1284_v1 = vrot.slane %v3856_v19, 1  ;;  %v1290_v41 = vmax.f32 %v1288_v13, %v1289_v10  ;;  %v3870_v49 = vmax.f32 %v1538_v53, %v1539_v23  ;;  %v1414_v4 = vmax.f32 %v1382_v26, 0.0 }
 0x206   :  { %v1301_v30 = vrot.slane %v1300_v60, 4  ;;  %v1449_v33 = vsel %vm1419_vm5, %v1415_v14, 0.0  ;;  %v1168_v29 = vadd.f32 %v3271_v16, %v1132_v3  ;;  %v1133_v8 = vmul.f32 %v3263_v45, %v930_v62 }
 0x207   :  { %v1296_v46 = vrot.slane %v1295_v9, 2  ;;  %v1550_v11 = vmax.f32 %v1414_v4, %v1449_v33  ;;  %v1384_v39 = vadd.f32 %v3277_v61, %v1348_v12  ;;  %v1349_v21 = vmul.f32 %v3267_v27, %v932_v37 }
 0x208   :  { %v1534_v44 = vrot.slane %v3867_v59, 1  ;;  %v1546_v13 = vrot.slane %v1545_v63, 2  ;;  %v1302_v53 = vmax.f32 %v1300_v60, %v1301_v30  ;;  %v1169_v22 = vadd.f32 %v3271_v16, %v1133_v8 }
 0x209   :  { %v1291_v10 = vrot.slane %v1290_v41, 1  ;;  %v1551_v23 = vrot.slane %v1550_v11, 4  ;;  %v1385_v6 = vadd.f32 %v3277_v61, %v1349_v21  ;;  %v1506_v26 = vrot.slane %v3808_v40, 1 }
 0x20a   :  { %v1541_v45 = vrot.slane %v3870_v49, 1  ;;  %v1303_v62 = vrot.slane %v1302_v53, 2  ;;  %v1200_v43 = vmax.f32 %v1168_v29, 0.0  ;;  %v1201_v42 = vmax.f32 %v1169_v22, 0.0 }
 0x20b   :  { %v1297_v38 = vmax.f32 %v1295_v9, %v1296_v46  ;;  %v1552_v3 = vmax.f32 %v1550_v11, %v1551_v23  ;;  %v1416_v27 = vmax.f32 %v1384_v39, 0.0  ;;  %v1417_v12 = vmax.f32 %v1385_v6, 0.0 }
 0x20c   :  { %v1547_v14 = vmax.f32 %v1545_v63, %v1546_v13  ;;  %v1307_v37 = vmax.f32 %v1200_v43, %v1201_v42  ;;  %v4039_v60 = vrot.slane %v3777_v47, 1  ;;  %v1870_v61 = vsel %vm1832_vm7, %v3642_v5, %v3346_v57 }
 0x20d   :  { %v1553_v4 = vrot.slane %v1552_v3, 2  ;;  %v1451_v30 = vsel %vm1419_vm5, %v1417_v12, 0.0  ;;  %v1507_v33 = vmax.f32 %v3808_v40, %v1506_v26  ;;  %v1871_v9 = vsel %vm1834_vm9, %v3652_v58, %v1870_v61 }
 0x20e   :  { %v1500_v16 = vmax.f32 %v3777_v47, %v4039_v60  ;;  %v1304_v29 = vmax.f32 %v1302_v53, %v1303_v62  ;;  %v1308_v63 = vrot.slane %v1307_v37, 4  ;;  %v1557_v8 = vmax.f32 %v1416_v27, %v1451_v30 }
 0x20f   :  { %v1872_v46 = vsel %vm1836_vm10, %v3700_v55, %v1871_v9  ;;  %v1554_v47 = vmax.f32 %v1552_v3, %v1553_v4  ;;  %v2745_v40 = vmov 0.0   ;;  %v1298_v58 = vrot.slane %v1297_v38, 1 }
 0x210   :  { %v1873_v57 = vsel %vm1838_vm11, %v3721_v50, %v1872_v46  ;;  %v1309_v5 = vmax.f32 %v1307_v37, %v1308_v63  ;;  %v1558_v11 = vrot.slane %v1557_v8, 4  ;;  %2396 = vmatprep.subr.bf16.mxu1 %v2745_v40  ;;  %v1548_v21 = vrot.slane %v1547_v14, 1 }
 0x211   :  { %v1874_v39 = vsel %vm1840_vm12, %v1500_v16, %v1873_v57  ;;  %v1841_v55 = vsel %vm1840_vm12, %v3775_v48, %v3612_v34  ;;  %v1305_v53 = vrot.slane %v1304_v29, 1  ;;  %v1844_v6 = vsel %vm1830_vm6, %v3847_v51, %v3816_v0 }
 0x212   :  { %v1875_v13 = vsel %vm1842_vm13, %v1507_v33, %v1874_v39  ;;  %v1310_v22 = vrot.slane %v1309_v5, 2  ;;  %v1559_v23 = vmax.f32 %v1557_v8, %v1558_v11  ;;  %v1843_v50 = vsel %vm1842_vm13, %v3812_v2, %v1841_v55  ;;  %v4048_v55 = vld [vmem:[#allocation22_spill] sm:$0xff] }
 0x213   :  { %v1528_v26 = vmax.f32 %v3854_v35, %v1527_v54  ;;  %v1285_v62 = vmax.f32 %v3856_v19, %v1284_v1  ;;  %v1555_v43 = vrot.slane %v1554_v47, 1  ;;  %v1535_v42 = vmax.f32 %v3867_v59, %v1534_v44 }
 0x214   :  { %v1292_v34 = vmax.f32 %v1290_v41, %v1291_v10  ;;  %v1311_v48 = vmax.f32 %v1309_v5, %v1310_v22  ;;  %v1560_v3 = vrot.slane %v1559_v23, 2  ;;  %v1876_v2 = vsel %vm1830_vm6, %v3852_v25, %v3825_v24  ;;  %v4046_v5 = vld [vmem:[#allocation24_spill] sm:$0xff] }
 0x215   :  { %v1845_v27 = vsel %vm1832_vm7, %v3863_v56, %v1844_v6  ;;  %v1542_v0 = vmax.f32 %v3870_v49, %v1541_v45  ;;  %v1299_v51 = vmax.f32 %v1297_v38, %v1298_v58  ;;  %v1549_v12 = vmax.f32 %v1547_v14, %v1548_v21  ;;  %v2630_v21 = vld [vmem:[#allocation6 + $0xb8] sm:$0xff]  }
 0x216   :  { %v1306_v35 = vmax.f32 %v1304_v29, %v1305_v53  ;;  %v1312_v54 = vrot.slane %v1311_v48, 1  ;;  %v1561_v19 = vmax.f32 %v1559_v23, %v1560_v3  ;;  %v1667_v1 = vmax.f32 %v3762_v7, 0.0  ;;  %v4049_v53 = vld [vmem:[#allocation20_spill] sm:$0xff]  ;;  %v4051_v6 = vld [vmem:[#allocation14_spill] sm:$0xff] }
 0x217   :  { %v1846_v59 = vsel %vm1834_vm9, %v1285_v62, %v1845_v27  ;;  %v1556_v41 = vmax.f32 %v1554_v47, %v1555_v43  ;;  %v1877_v44 = vsel %vm1832_vm7, %v1528_v26, %v1876_v2  ;;  %v4040_v49 = vmax.f32 %v3686_v20, 0.0  ;;  %v4044_v47 = vld [vmem:[#allocation23_spill] sm:$0xff] }
 0x218   :  { %v1847_v10 = vsel %vm1836_vm10, %v1292_v34, %v1846_v59  ;;  %v1313_v24 = vmax.f32 %v1311_v48, %v1312_v54  ;;  %v1562_v25 = vrot.slane %v1561_v19, 1  ;;  %v1878_v56 = vsel %vm1834_vm9, %v1535_v42, %v1877_v44  ;;  %v4052_v62 = vld [vmem:[#allocation15_spill] sm:$0xff]  ;;  %v4053_v48 = vld [vmem:[#allocation13_spill] sm:$0xff] }
 0x219   :  { %v1793_v45 = vmax.f32 %v4040_v49, %v3726_v32  ;;  %v4041_v38 = vmax.f32 %v3794_v28, 0.0  ;;  %v1848_v14 = vsel %vm1838_vm11, %v1299_v51, %v1847_v10  ;;  %v1879_v37 = vsel %vm1836_vm10, %v1542_v0, %v1878_v56  ;;  %v2631_v59 = vld [vmem:[#allocation6 + $0xb0] sm:$0xff]  }
 0x21a   :  { %v1787_v60 = vrot.slane %v3733_v18, 4  ;;  %v1563_v16 = vmax.f32 %v1561_v19, %v1562_v25  ;;  %v1880_v61 = vsel %vm1838_vm11, %v1549_v12, %v1879_v37  ;;  %v1849_v4 = vsel %vm1840_vm12, %v1306_v35, %v1848_v14  ;;  %v4056_v12 = vld [vmem:[#allocation21_spill] sm:$0xff] }
 0x21b   :  { %v1699_v7 = vsel %vm1669_vm8, %v4041_v38, 0.0  ;;  %v4042_v30 = vrot.slane %v3683_v31, 4  ;;  %v1666_v32 = vmax.f32 %v3729_v17, 0.0  ;;  %v1881_v28 = vsel %vm1840_vm12, %v1556_v41, %v1880_v61  ;;  %v4059_v41 = vld [vmem:[#allocation18_spill] sm:$0xff]  ;;  %v4060_v10 = vld [vmem:[#allocation17_spill] sm:$0xff] }
 0x21c   :  { %v1850_v33 = vsel %vm1842_vm13, %v1313_v24, %v1849_v4  ;;  %v1775_v9 = vrot.slane %v3709_v15, 2  ;;  %v1701_v29 = vsel %vm1669_vm8, %v1667_v1, 0.0  ;;  %v4043_v63 = vmax.f32 %v3745_v36, 0.0 }
 0x21d   :  { %v1781_v20 = vmax.f32 %v3683_v31, %v4042_v30  ;;  %v1882_v46 = vsel %vm1842_vm13, %v1563_v16, %v1881_v28  ;;  %v4045_v57 = vrot.slane %v4044_v47, 2  ;;  %v4047_v17 = vrot.slane %v4046_v5, 2  ;;  %v2632_v28 = vld [vmem:[#allocation6 + $0xa8] sm:$0xff]  }
 0x21e   :  { %v1800_v8 = vmax.f32 %v4043_v63, %v1699_v7  ;;  %v1794_v39 = vrot.slane %v1793_v45, 4  ;;  %v1918_v58 = vpack.c.bf16 %v1882_v46, %v1875_v13  ;;  %v4050_v52 = vmax.f32 %v4049_v53, 0.0  ;;  %v4055_v13 = vld [vmem:[#allocation19_spill] sm:$0xff] }
 0x21f   :  { %v1769_v31 = vmax.f32 %v4044_v47, %v4045_v57  ;;  %v1762_v11 = vmax.f32 %v4046_v5, %v4047_v17  ;;  %v1788_v36 = vmax.f32 %v3733_v18, %v1787_v60  ;;  %v1917_v23 = vpack.c.bf16 %v1850_v33, %v1843_v50  ;;  %v4057_v18 = vld [vmem:[#allocation16_spill] sm:$0xff] }
 0x220   :  { %v1744_v22 = vmax.f32 %v4050_v52, %v4048_v55  ;;  %v1712_v26 = vrot.slane %v4051_v6, 2  ;;  %v1705_v43 = vrot.slane %v4052_v62, 2  ;;  %v1782_v42 = vrot.slane %v1781_v20, 2  ;;  %2148 = vmatprep.mubr.bf16.mxu1 %v1918_v58 }
 0x221   :  { %v1807_v34 = vmax.f32 %v1666_v32, %v1701_v29  ;;  %v4054_v3 = vrot.slane %v4053_v48, 4  ;;  %v1738_v27 = vrot.slane %v4055_v13, 4  ;;  %v1776_v0 = vmax.f32 %v3709_v15, %v1775_v9  ;;  %2149 = vmatmul.mubr.bf16.vlgmr.msra.gmra.mxu1 %v1917_v23 }
 0x222   :  { %v1801_v51 = vrot.slane %v1800_v8, 4  ;;  %v4058_v50 = vmax.f32 %v4057_v18, 0.0  ;;  %v1770_v54 = vrot.slane %v1769_v31, 1  ;;  %v1763_v19 = vrot.slane %v1762_v11, 1  ;;  %2397 = vmatpush3.bf16.msra.mxu1 %v2630_v21  ;;  %2412 = vmatprep.mubr.msk.bf16.mxu1 %vm2746_vm14, %v2745_v40  ;;  %v2633_v21 = vld [vmem:[#allocation6 + $0xa0] sm:$0xff]  }
 0x223   :  { %v1725_v2 = vmax.f32 %v4053_v48, %v4054_v3  ;;  %v1795_v1 = vmax.f32 %v1793_v45, %v1794_v39  ;;  %v1719_v44 = vrot.slane %v4059_v41, 2  ;;  %v4061_v24 = vrot.slane %v4060_v10, 4  ;;  %2398 = vmatprep.subr.bf16.mxu1 %v2745_v40 }
 0x224   :  { %v1751_v35 = vmax.f32 %v4058_v50, %v4056_v12  ;;  %v1745_v25 = vrot.slane %v1744_v22, 4  ;;  %v1789_v56 = vrot.slane %v1788_v36, 2  ;;  %v1713_v49 = vmax.f32 %v4051_v6, %v1712_v26 }
 0x225   :  { %v1732_v15 = vmax.f32 %v4060_v10, %v4061_v24  ;;  %v1706_v38 = vmax.f32 %v4052_v62, %v1705_v43  ;;  %v1783_v45 = vmax.f32 %v1781_v20, %v1782_v42  ;;  %v1808_v7 = vrot.slane %v1807_v34, 4 }
 0x226   :  { %v1726_v14 = vrot.slane %v1725_v2, 2  ;;  %v1739_v37 = vmax.f32 %v4055_v13, %v1738_v27  ;;  %v1777_v60 = vrot.slane %v1776_v0, 1  ;;  %v1802_v16 = vmax.f32 %v1800_v8, %v1801_v51  ;;  %2399 = vmatpush3.bf16.msra.mxu1 %v2631_v59 }
 0x227   :  { %v1752_v61 = vrot.slane %v1751_v35, 4  ;;  %v1771_v4 = vmax.f32 %v1769_v31, %v1770_v54  ;;  %v1764_v30 = vmax.f32 %v1762_v11, %v1763_v19  ;;  %v1796_v32 = vrot.slane %v1795_v1, 2  ;;  %2400 = vmatprep.subr.bf16.mxu1 %v2745_v40 }
 0x228   :  { %v1720_v33 = vmax.f32 %v4059_v41, %v1719_v44  ;;  %v1733_v9 = vrot.slane %v1732_v15, 2  ;;  %v1746_v29 = vmax.f32 %v1744_v22, %v1745_v25  ;;  %v1790_v63 = vmax.f32 %v1788_v36, %v1789_v56  ;;  %v2635_v41 = vld [vmem:[#allocation6 + $0x90] sm:$0xff]  }
 0x229   :  { %v1714_v20 = vrot.slane %v1713_v49, 1  ;;  %v1784_v46 = vrot.slane %v1783_v45, 1  ;;  %v1809_v47 = vmax.f32 %v1807_v34, %v1808_v7  ;;  %v1707_v57 = vrot.slane %v1706_v38, 1 }
 0x22a   :  { %v1727_v5 = vmax.f32 %v1725_v2, %v1726_v14  ;;  %v1778_v17 = vmax.f32 %v1776_v0, %v1777_v60  ;;  %v1803_v8 = vrot.slane %v1802_v16, 2  ;;  %v1740_v39 = vrot.slane %v1739_v37, 2  ;;  %2401 = vmatpush3.bf16.msra.mxu1 %v2632_v28  ;;  %v2634_v2 = vld [vmem:[#allocation6 + $0x98] sm:$0xff]  }
 0x22b   :  { %v1753_v31 = vmax.f32 %v1751_v35, %v1752_v61  ;;  %v1908_v11 = vsel %vm1830_vm6, %v1771_v4, %v1764_v30  ;;  %v1797_v58 = vmax.f32 %v1795_v1, %v1796_v32  ;;  %v1721_v55 = vrot.slane %v1720_v33, 1  ;;  %2402 = vmatprep.subr.bf16.mxu1 %v2745_v40  ;;  %v2637_v30 = vld [vmem:[#allocation6 + $0x80] sm:$0xff]  }
 0x22c   :  { %v1734_v53 = vmax.f32 %v1732_v15, %v1733_v9  ;;  %v1747_v52 = vrot.slane %v1746_v29, 2  ;;  %v1791_v22 = vrot.slane %v1790_v63, 1  ;;  %v1785_v36 = vmax.f32 %v1783_v45, %v1784_v46  ;;  %v2636_v45 = vld [vmem:[#allocation6 + $0x88] sm:$0xff]  }
 0x22d   :  { %v1810_v23 = vrot.slane %v1809_v47, 2  ;;  %v1715_v6 = vmax.f32 %v1713_v49, %v1714_v20  ;;  %v1708_v26 = vmax.f32 %v1706_v38, %v1707_v57  ;;  %v1909_v62 = vsel %vm1832_vm7, %v1778_v17, %v1908_v11  ;;  %v4062_v46 = vld [vmem:[#allocation12_spill] sm:$0xff]  ;;  %v2646_v17 = vld [vmem:[#allocation7] sm:$0xff] }
 0x22e   :  { %v1804_v43 = vmax.f32 %v1802_v16, %v1803_v8  ;;  %v1728_v42 = vrot.slane %v1727_v5, 1  ;;  %v1741_v34 = vmax.f32 %v1739_v37, %v1740_v39  ;;  %v1754_v48 = vrot.slane %v1753_v31, 2  ;;  %2403 = vmatpush3.bf16.msra.mxu1 %v2633_v21 }
 0x22f   :  { %v1798_v3 = vrot.slane %v1797_v58, 1  ;;  %v1722_v13 = vmax.f32 %v1720_v33, %v1721_v55  ;;  %v1735_v27 = vrot.slane %v1734_v53, 1  ;;  %v1748_v0 = vmax.f32 %v1746_v29, %v1747_v52  ;;  %2404 = vmatprep.subr.bf16.mxu1 %v2745_v40 }
 0x230   :  { %v1792_v51 = vmax.f32 %v1790_v63, %v1791_v22  ;;  %v1811_v12 = vmax.f32 %v1809_v47, %v1810_v23  ;;  %v1910_v18 = vsel %vm1834_vm9, %v1785_v36, %v1909_v62  ;;  %v1901_v50 = vsel %vm1830_vm6, %v1715_v6, %v1708_v26 }
 0x231   :  { %v1805_v35 = vrot.slane %v1804_v43, 1  ;;  %v1729_v54 = vmax.f32 %v1727_v5, %v1728_v42  ;;  %v1742_v19 = vrot.slane %v1741_v34, 1  ;;  %v1755_v1 = vmax.f32 %v1753_v31, %v1754_v48 }
 0x232   :  { %v1799_v59 = vmax.f32 %v1797_v58, %v1798_v3  ;;  %2405 = vmatpush3.bf16.msra.mxu1 %v2634_v2  ;;  %v1902_v44 = vsel %vm1832_vm7, %v1722_v13, %v1901_v50  ;;  %v1736_v10 = vmax.f32 %v1734_v53, %v1735_v27  ;;  %v1749_v24 = vrot.slane %v1748_v0, 1 }
 0x233   :  { %2406 = vmatprep.subr.bf16.mxu1 %v2745_v40  ;;  %v1911_v15 = vsel %vm1836_vm10, %v1792_v51, %v1910_v18  ;;  %v1812_v25 = vrot.slane %v1811_v12, 1  ;;  %v1806_v56 = vmax.f32 %v1804_v43, %v1805_v35  ;;  %v1743_v49 = vmax.f32 %v1741_v34, %v1742_v19 }
 0x234   :  { %v1756_v38 = vrot.slane %v1755_v1, 1  ;;  %v1903_v7 = vsel %vm1834_vm9, %v1729_v54, %v1902_v44  ;;  %v1912_v14 = vsel %vm1838_vm11, %v1799_v59, %v1911_v15  ;;  %v1750_v37 = vmax.f32 %v1748_v0, %v1749_v24 }
 0x235   :  { %v1904_v60 = vsel %vm1836_vm10, %v1736_v10, %v1903_v7  ;;  %v1813_v16 = vmax.f32 %v1811_v12, %v1812_v25  ;;  %v1913_v61 = vsel %vm1840_vm12, %v1806_v56, %v1912_v14  ;;  %v1970_v47 = vsub.s32 6, %v4062_v46 }
 0x236   :  { %2407 = vmatpush3.bf16.msra.mxu1 %v2635_v41  ;;  %v1757_v4 = vmax.f32 %v1755_v1, %v1756_v38  ;;  %v1905_v32 = vsel %vm1838_vm11, %v1743_v49, %v1904_v60 }
 0x237   :  { %2408 = vmatprep.subr.bf16.mxu1 %v2745_v40  ;;  %v1906_v28 = vsel %vm1840_vm12, %v1750_v37, %v1905_v32  ;;  %v1914_v33 = vsel %vm1842_vm13, %v1813_v16, %v1913_v61  ;;  %v1971_v8 = vrot.slane %v2646_v17, %v1970_v47 }
 0x238   :  { %v1907_v9 = vsel %vm1842_vm13, %v1757_v4, %v1906_v28 }
 0x239   :  { %v1919_v29 = vpack.c.bf16 %v1914_v33, %v1907_v9 }
 0x23a   :  { %2409 = vmatpush3.bf16.msra.mxu1 %v2636_v45 }
 0x23b   :  { %2410 = vmatprep.subr.bf16.mxu1 %v2745_v40 }
 0x23e   :  { %2411 = vmatpush3.bf16.msra.mxu1 %v2637_v30 }
 0x241   :  { %2413 = vmatmul.mubr.bf16.vlgmr.msra.gmra.mxu1 %v1919_v29 }
 0x2e1   :  { %v2337_v63 = vpop.f32.mrf.mxu1 }
 0x2e3   :  { %v2338_v20 = vpop.f32.mrf.mxu1 }
 0x2e4   :  { %v2339_v5 = vadd.f32 %v2338_v20, %v2337_v63 }
 0x2e5   :  { %v2340_v57 = vpop.f32.mrf.mxu1 }
 0x2e6   :  { %v2151_v40 = vadd.f32 %v2339_v5, %v1971_v8 }
 0x2e7   :  { %v2341_v39 = vpop.f32.mrf.mxu1 }
 0x2e8   :  { %v2342_v31 = vadd.f32 %v2341_v39, %v2340_v57 }
 0x2ea   :  { %v2154_v55 = vadd.f32 %v2342_v31, %v1971_v8 }
 0x301   :  { %v2191_v11 = vpop.f32.mrf.mxu1 }
 0x302   :  { %v2192_v58 = vadd.f32 %v2191_v11, %v2151_v40 }
 0x303   :  { %v2414_v21 = vpop.f32.mrf.mxu1 }
 0x304   :  { %2198 = vmax.xlane.f32.xlu0 %v2192_v58 }
 0x305   :  { %v2194_v53 = vpop.f32.mrf.mxu1 }
 0x306   :  { %v2195_v52 = vadd.f32 %v2194_v53, %v2154_v55 }
 0x307   :  { %v2415_v22 = vpop.f32.mrf.mxu1 }
 0x308   :  { %2200 = vmax.xlane.f32.xlu1 %v2195_v52 }
 0x38d   :  { %v2199_v36 = vpop.xlane.xlu0 %2198 }
 0x38e   :  { %v2202_v23 = vsub.f32 %v2192_v58, %v2199_v36 }
 0x390   :  { %v2204_v6 = vmul.f32 1.442695, %v2202_v23 }
 0x391   :  { %v2201_v26 = vpop.xlane.xlu1 %2200 }
 0x392   :  { %2638 = vpow2.f32 %v2204_v6  ;;  %v2203_v62 = vsub.f32 %v2195_v52, %v2201_v26 }
 0x394   :  { %v2206_v43 = vmul.f32 1.442695, %v2203_v62 }
 0x396   :  { %2640 = vpow2.f32 %v2206_v43 }
 0x39f   :  { %v2639_v42 = vpop.eup %2638 }
 0x3a0   :  { %2208 = vadd.xlane.f32.xlu0 %v2639_v42 }
 0x3a3   :  { %v2641_v34 = vpop.eup %2640 }
 0x3a4   :  { %2210 = vadd.xlane.f32.xlu0 %v2641_v34 }
 0x429   :  { %v2209_v48 = vpop.xlane.xlu0 %2208 }
 0x42a   :  { %2642 = vrcp.f32 %v2209_v48 }
 0x42d   :  { %v2211_v3 = vpop.xlane.xlu0 %2210 }
 0x42e   :  { %2644 = vrcp.f32 %v2211_v3 }
 0x437   :  { %v2643_v2 = vpop.eup %2642 }
 0x438   :  { %v2214_v13 = vmul.f32 %v2643_v2, %v2639_v42 }
 0x43a   :  { %2216 = vst [vmem:[%s4010_s4] sm:$0xff] %v2214_v13 }
 0x43b   :  { %v2645_v27 = vpop.eup %2644 }
 0x43c   :  { %v2215_v0 = vmul.f32 %v2645_v27, %v2641_v34 }
 0x43e   :  { %2217 = vst [vmem:[%s4010_s4 + $0x8] sm:$0xff] %v2215_v0 }
 0x43f   :  { %2222 = vsyncpa [#allocation3], 1 }
 0x440   :  { %2223 = vsyncpa [#allocation5], 1 }
 0x441   :  { %2224 = vsyncpa [#allocation8], 1 }

</bundles_post_ra>
